<compile_context>
chip_gen: v7x
topology: tpu7x:2x2x1
jax: 0.10.0
libtpu: 0.0.40
codegen_flags: <defaults>
</compile_context>

<pallas_src>
from functools import partial

import jax
import jax.numpy as jnp
from jax.experimental import pallas as pl
from jax.experimental.pallas import tpu as pltpu


# ------------------------------ fused layer kernel ------------------------------
def _encoder_layer_kernel(src_ref, pos_ref, bias_ref,
                          wqkv_ref, bqkv_ref, wo_ref, bo_ref, norms_ref,
                          w1_ref, b1_ref, w2_ref, b2_ref,
                          o_ref, *, num_heads, normalize_before):
    f32 = jnp.float32
    x = src_ref[0]                     # (L, D)  activations for this batch element
    pos = pos_ref[...]                 # (L, D)  shared positional embedding
    bias = bias_ref[0]                 # (1, L)  additive key-padding bias
    L, D = x.shape
    H = num_heads
    Dh = D // H
    scale = Dh ** -0.5

    wqkv = wqkv_ref[...]               # (D, 3D)  columns ordered [q | k | v]
    bqkv = bqkv_ref[...]               # (1, 3D)

    def layer_norm(h, row):
        g = norms_ref[row:row + 1, :]
        b = norms_ref[row + 1:row + 2, :]
        mean = jnp.mean(h, axis=-1, keepdims=True)
        var = jnp.mean((h - mean) ** 2, axis=-1, keepdims=True)
        return (h - mean) * jax.lax.rsqrt(var + 1e-5) * g + b

    def self_attention(attn_in):
        # Fused QKV: one lane-dense (L,D)x(D,3D) MXU pass. pos contributes to q,k only.
        qkv = jnp.dot(attn_in, wqkv, preferred_element_type=f32) + bqkv
        pos_qk = jnp.dot(pos, wqkv[:, :2 * D], preferred_element_type=f32)
        q = (qkv[:, :D] + pos_qk[:, :D]) * scale
        k = qkv[:, D:2 * D] + pos_qk[:, D:]
        v = qkv[:, 2 * D:]

        heads = []
        for h in range(H):                      # static unroll: all heads in one kernel step
            sl = slice(h * Dh, (h + 1) * Dh)
            s = jax.lax.dot_general(q[:, sl], k[:, sl], (((1,), (1,)), ((), ())),
                                    preferred_element_type=f32)       # (L, L)
            s = s + bias                                               # key-padding mask
            m = jnp.max(s, axis=-1, keepdims=True)
            p = jnp.exp(s - m)
            p = p * pl.reciprocal(jnp.sum(p, axis=-1, keepdims=True), approx=True)
            heads.append(jnp.dot(p, v[:, sl], preferred_element_type=f32))
        attn = jnp.concatenate(heads, axis=-1)                         # (L, D)
        return jnp.dot(attn, wo_ref[...], preferred_element_type=f32) + bo_ref[...]

    def ffn(h):
        t = jnp.dot(h, w1_ref[...], preferred_element_type=f32) + b1_ref[...]
        t = jnp.maximum(t, 0.0)                                        # relu activation
        return jnp.dot(t, w2_ref[...], preferred_element_type=f32) + b2_ref[...]

    if not normalize_before:
        # forward_post (PyTorch default: normalize_before=False)
        src1 = layer_norm(x + self_attention(x), 0)
        out = layer_norm(src1 + ffn(src1), 2)
    else:
        # forward_pre
        src2 = layer_norm(x, 0)
        src1 = x + self_attention(src2)
        out = src1 + ffn(layer_norm(src1, 2))

    o_ref[0] = out


# ------------------------------ wrapper ------------------------------
def pack_encoder_layer_params(p):
    """Pack weights once (biases -> (1,N), LayerNorm params -> (4,D)) so per-call XLA work is zero."""
    f32 = jnp.float32
    return dict(
        w_qkv=jnp.asarray(p['w_qkv'], f32),
        b_qkv=jnp.asarray(p['b_qkv'], f32).reshape(1, -1),
        w_o=jnp.asarray(p['w_o'], f32),
        b_o=jnp.asarray(p['b_o'], f32).reshape(1, -1),
        norms=jnp.stack([p['norm1_g'], p['norm1_b'],
                         p['norm2_g'], p['norm2_b']]).astype(f32),
        w1=jnp.asarray(p['w1'], f32),
        b1=jnp.asarray(p['b1'], f32).reshape(1, -1),
        w2=jnp.asarray(p['w2'], f32),
        b2=jnp.asarray(p['b2'], f32).reshape(1, -1),
    )


def transformer_encoder_layer(src, packed, *, num_heads, pos=None,
                              src_key_padding_mask=None, normalize_before=False):
    """PyTorch-convention inputs: src (L, B, D); pos (L, D) / (L, 1|B, D) / None (shared over batch);
    src_key_padding_mask (B, L) bool (True = padded). Returns (L, B, D)."""
    # TODO(synk): src_mask (additive attn_mask) argument of the PyTorch layer is not supported.
    L, B, D = src.shape
    DF = packed['w1'].shape[1]

    src_bld = jnp.transpose(src, (1, 0, 2)).astype(jnp.float32)     # (B, L, D)

    if pos is None:
        pos2d = jnp.zeros((L, D), jnp.float32)
    else:
        pos2d = jnp.asarray(pos, jnp.float32)
        if pos2d.ndim == 3:                                          # DETR usage: same pos per batch
            pos2d = pos2d[:, 0, :]

    if src_key_padding_mask is None:
        bias = jnp.zeros((B, 1, L), jnp.float32)
    else:
        bias = jnp.where(src_key_padding_mask, -1e9, 0.0).astype(jnp.float32).reshape(B, 1, L)

    kernel = partial(_encoder_layer_kernel, num_heads=num_heads,
                     normalize_before=normalize_before)

    out = pl.pallas_call(
        kernel,
        out_shape=jax.ShapeDtypeStruct((B, L, D), jnp.float32),
        grid=(B,),
        in_specs=[
            pl.BlockSpec((1, L, D), lambda b: (b, 0, 0)),        # src (per-batch block)
            pl.BlockSpec((L, D), lambda b: (0, 0)),              # pos (same block every step)
            pl.BlockSpec((1, 1, L), lambda b: (b, 0, 0)),        # key-padding bias
            pl.BlockSpec((D, 3 * D), lambda b: (0, 0)),          # fused QKV weight
            pl.BlockSpec((1, 3 * D), lambda b: (0, 0)),          # fused QKV bias
            pl.BlockSpec((D, D), lambda b: (0, 0)),              # out-proj weight
            pl.BlockSpec((1, D), lambda b: (0, 0)),              # out-proj bias
            pl.BlockSpec((4, D), lambda b: (0, 0)),              # packed LayerNorm params
            pl.BlockSpec((D, DF), lambda b: (0, 0)),             # FFN linear1 weight
            pl.BlockSpec((1, DF), lambda b: (0, 0)),             # FFN linear1 bias
            pl.BlockSpec((DF, D), lambda b: (0, 0)),             # FFN linear2 weight
            pl.BlockSpec((1, D), lambda b: (0, 0)),              # FFN linear2 bias
        ],
        out_specs=pl.BlockSpec((1, L, D), lambda b: (b, 0, 0)),
        compiler_params=pltpu.CompilerParams(dimension_semantics=("parallel",)),
    )(src_bld, pos2d, bias,
      packed['w_qkv'], packed['b_qkv'], packed['w_o'], packed['b_o'],
      packed['norms'], packed['w1'], packed['b1'], packed['w2'], packed['b2'])

    return jnp.transpose(out, (1, 0, 2))                             # back to (L, B, D)


# ------------------------------ pure-JAX reference ------------------------------
def reference_layer(src, pos, key_padding_mask, p, num_heads, normalize_before):
    """Eval-mode replica of TransformerEncoderLayer.forward (dropout = identity)."""
    L, B, D = src.shape
    H = num_heads
    Dh = D // H
    pos_b = (jnp.broadcast_to(jnp.asarray(pos, jnp.float32), (L, B, D))
             if pos is not None else jnp.zeros((L, B, D), jnp.float32))

    def ln(x, g, b):
        m = jnp.mean(x, -1, keepdims=True)
        v = jnp.mean((x - m) ** 2, -1, keepdims=True)
        return (x - m) / jnp.sqrt(v + 1e-5) * g + b

    def mha(qk_in, v_in):
        q = qk_in @ p['w_qkv'][:, :D] + p['b_qkv'][:D]
        k = qk_in @ p['w_qkv'][:, D:2 * D] + p['b_qkv'][D:2 * D]
        v = v_in @ p['w_qkv'][:, 2 * D:] + p['b_qkv'][2 * D:]
        q = q.reshape(L, B, H, Dh).transpose(1, 2, 0, 3) * Dh ** -0.5
        k = k.reshape(L, B, H, Dh).transpose(1, 2, 0, 3)
        v = v.reshape(L, B, H, Dh).transpose(1, 2, 0, 3)
        s = jnp.einsum('bhqd,bhkd->bhqk', q, k)
        if key_padding_mask is not None:
            s = s + jnp.where(key_padding_mask, -1e9, 0.0)[:, None, None, :]
        a = jax.nn.softmax(s, -1)
        o = jnp.einsum('bhqk,bhkd->bhqd', a, v).transpose(2, 0, 1, 3).reshape(L, B, D)
        return o @ p['w_o'] + p['b_o']

    def ffn(x):
        return jnp.maximum(x @ p['w1'] + p['b1'], 0.0) @ p['w2'] + p['b2']

    if not normalize_before:
        s = ln(src + mha(src + pos_b, src), p['norm1_g'], p['norm1_b'])
        return ln(s + ffn(s), p['norm2_g'], p['norm2_b'])
    s2 = ln(src, p['norm1_g'], p['norm1_b'])
    s = src + mha(s2 + pos_b, s2)
    return s + ffn(ln(s, p['norm2_g'], p['norm2_b']))


# ------------------------------ main ------------------------------
if __name__ == "__main__":
    D_MODEL, NHEAD, DIM_FF = 32, 4, 64
    SEQ, BATCH = 64, 2                      # SEQ is a multiple of 8 (sublane aligned)

    key = jax.random.PRNGKey(0)
    ks = jax.random.split(key, 16)

    def W(k, shape, s=0.05):
        return (s * jax.random.normal(k, shape)).astype(jnp.float32)

    params = dict(
        w_qkv=W(ks[0], (D_MODEL, 3 * D_MODEL)),       # = in_proj_weight.T, columns [q|k|v]
        b_qkv=W(ks[1], (3 * D_MODEL,)),
        w_o=W(ks[2], (D_MODEL, D_MODEL)),
        b_o=W(ks[3], (D_MODEL,)),
        norm1_g=jnp.ones((D_MODEL,), jnp.float32) + W(ks[4], (D_MODEL,), 0.01),
        norm1_b=W(ks[5], (D_MODEL,)),
        norm2_g=jnp.ones((D_MODEL,), jnp.float32) + W(ks[6], (D_MODEL,), 0.01),
        norm2_b=W(ks[7], (D_MODEL,)),
        w1=W(ks[8], (D_MODEL, DIM_FF)),
        b1=W(ks[9], (DIM_FF,)),
        w2=W(ks[10], (DIM_FF, D_MODEL)),
        b2=W(ks[11], (D_MODEL,)),
    )
    packed = pack_encoder_layer_params(params)

    src = jax.random.normal(ks[12], (SEQ, BATCH, D_MODEL), jnp.float32)
    pos = 0.1 * jax.random.normal(ks[13], (SEQ, 1, D_MODEL), jnp.float32)   # shared pos embedding
    key_padding_mask = jnp.zeros((BATCH, SEQ), bool).at[1, -8:].set(True)   # pad last 8 keys of b=1

    out_post = transformer_encoder_layer(src, packed, num_heads=NHEAD, pos=pos,
                                         src_key_padding_mask=key_padding_mask,
                                         normalize_before=False)
    out_pre = transformer_encoder_layer(src, packed, num_heads=NHEAD, pos=pos,
                                        src_key_padding_mask=key_padding_mask,
                                        normalize_before=True)
    jax.block_until_ready(out_post)
    jax.block_until_ready(out_pre)

    ref_post = reference_layer(src, pos, key_padding_mask, params, NHEAD, False)
    ref_pre = reference_layer(src, pos, key_padding_mask, params, NHEAD, True)

    assert out_post.shape == (SEQ, BATCH, D_MODEL)
    assert out_pre.shape == (SEQ, BATCH, D_MODEL)
    assert bool(jnp.all(jnp.isfinite(out_post))) and bool(jnp.all(jnp.isfinite(out_pre)))
    assert bool(jnp.allclose(out_post, ref_post, atol=2e-2, rtol=2e-2))
    assert bool(jnp.allclose(out_pre, ref_pre, atol=2e-2, rtol=2e-2))
    print("KERNEL_OK")
</pallas_src>

<mosaic_0001>
module attributes {stable_mosaic.version = 11 : i64} {
  func.func @_encoder_layer_kernel(%arg0: i32, %arg1: memref<1x64x32xf32, #tpu.memory_space<vmem>>, %arg2: memref<64x32xf32, #tpu.memory_space<vmem>>, %arg3: memref<1x1x64xf32, #tpu.memory_space<vmem>>, %arg4: memref<32x96xf32, #tpu.memory_space<vmem>>, %arg5: memref<1x96xf32, #tpu.memory_space<vmem>>, %arg6: memref<32x32xf32, #tpu.memory_space<vmem>>, %arg7: memref<1x32xf32, #tpu.memory_space<vmem>>, %arg8: memref<4x32xf32, #tpu.memory_space<vmem>>, %arg9: memref<32x64xf32, #tpu.memory_space<vmem>>, %arg10: memref<1x64xf32, #tpu.memory_space<vmem>>, %arg11: memref<64x32xf32, #tpu.memory_space<vmem>>, %arg12: memref<1x32xf32, #tpu.memory_space<vmem>>, %arg13: memref<1x64x32xf32, #tpu.memory_space<vmem>>) attributes {dimension_semantics = [#tpu.dimension_semantics<parallel>], iteration_bounds = array<i64: 2>, scalar_prefetch = 0 : i64, scratch_operands = 0 : i64, tpu.core_type = #tpu.core_type<tc>, window_params = [{transform_indices = @transform_0, window_bounds = array<i64: 1, 64, 32>}, {pipeline_mode = #tpu.pipeline_mode<synchronous>, transform_indices = @transform_1, window_bounds = array<i64: 64, 32>}, {transform_indices = @transform_2, window_bounds = array<i64: 1, 1, 64>}, {pipeline_mode = #tpu.pipeline_mode<synchronous>, transform_indices = @transform_3, window_bounds = array<i64: 32, 96>}, {pipeline_mode = #tpu.pipeline_mode<synchronous>, transform_indices = @transform_4, window_bounds = array<i64: 1, 96>}, {pipeline_mode = #tpu.pipeline_mode<synchronous>, transform_indices = @transform_5, window_bounds = array<i64: 32, 32>}, {pipeline_mode = #tpu.pipeline_mode<synchronous>, transform_indices = @transform_6, window_bounds = array<i64: 1, 32>}, {pipeline_mode = #tpu.pipeline_mode<synchronous>, transform_indices = @transform_7, window_bounds = array<i64: 4, 32>}, {pipeline_mode = #tpu.pipeline_mode<synchronous>, transform_indices = @transform_8, window_bounds = array<i64: 32, 64>}, {pipeline_mode = #tpu.pipeline_mode<synchronous>, transform_indices = @transform_9, window_bounds = array<i64: 1, 64>}, {pipeline_mode = #tpu.pipeline_mode<synchronous>, transform_indices = @transform_10, window_bounds = array<i64: 64, 32>}, {pipeline_mode = #tpu.pipeline_mode<synchronous>, transform_indices = @transform_11, window_bounds = array<i64: 1, 32>}, {transform_indices = @transform_12, window_bounds = array<i64: 1, 64, 32>}]} {
    %c0 = arith.constant 0 : index
    %c0_0 = arith.constant 0 : index
    %c0_1 = arith.constant 0 : index
    %0 = vector.load %arg1[%c0, %c0_0, %c0_1] : memref<1x64x32xf32, #tpu.memory_space<vmem>>, vector<1x64x32xf32>
    %1 = vector.shape_cast %0 : vector<1x64x32xf32> to vector<64x32xf32>
    %c0_2 = arith.constant 0 : index
    %c0_3 = arith.constant 0 : index
    %2 = vector.load %arg2[%c0_2, %c0_3] : memref<64x32xf32, #tpu.memory_space<vmem>>, vector<64x32xf32>
    %c0_4 = arith.constant 0 : index
    %c0_5 = arith.constant 0 : index
    %c0_6 = arith.constant 0 : index
    %3 = vector.load %arg3[%c0_4, %c0_5, %c0_6] : memref<1x1x64xf32, #tpu.memory_space<vmem>>, vector<1x1x64xf32>
    %4 = vector.shape_cast %3 : vector<1x1x64xf32> to vector<1x64xf32>
    %c0_7 = arith.constant 0 : index
    %c0_8 = arith.constant 0 : index
    %5 = vector.load %arg4[%c0_7, %c0_8] : memref<32x96xf32, #tpu.memory_space<vmem>>, vector<32x96xf32>
    %c0_9 = arith.constant 0 : index
    %c0_10 = arith.constant 0 : index
    %6 = vector.load %arg5[%c0_9, %c0_10] : memref<1x96xf32, #tpu.memory_space<vmem>>, vector<1x96xf32>
    %cst = arith.constant dense<0.000000e+00> : vector<64x96xf32>
    %7 = tpu.matmul %1, %5, %cst {dimension_numbers = #tpu.dot_dimension_numbers<[1], [0], [0], [1], [0, 0, 1, 1], [], []>} : vector<64x32xf32>, vector<32x96xf32>, vector<64x96xf32> -> vector<64x96xf32>
    %8 = vector.broadcast %6 : vector<1x96xf32> to vector<64x96xf32>
    %9 = arith.addf %7, %8 : vector<64x96xf32>
    %10 = vector.extract_strided_slice %5 {offsets = [0, 0], sizes = [32, 64], strides = [1, 1]} : vector<32x96xf32> to vector<32x64xf32>
    %cst_11 = arith.constant dense<0.000000e+00> : vector<64x64xf32>
    %11 = tpu.matmul %2, %10, %cst_11 {dimension_numbers = #tpu.dot_dimension_numbers<[1], [0], [0], [1], [0, 0, 1, 1], [], []>} : vector<64x32xf32>, vector<32x64xf32>, vector<64x64xf32> -> vector<64x64xf32>
    %12 = vector.extract_strided_slice %9 {offsets = [0, 0], sizes = [64, 32], strides = [1, 1]} : vector<64x96xf32> to vector<64x32xf32>
    %13 = vector.extract_strided_slice %11 {offsets = [0, 0], sizes = [64, 32], strides = [1, 1]} : vector<64x64xf32> to vector<64x32xf32>
    %14 = arith.addf %12, %13 : vector<64x32xf32>
    %cst_12 = arith.constant 0.353553385 : f32
    %15 = vector.broadcast %cst_12 : f32 to vector<64x32xf32>
    %16 = arith.mulf %14, %15 : vector<64x32xf32>
    %17 = vector.extract_strided_slice %9 {offsets = [0, 32], sizes = [64, 32], strides = [1, 1]} : vector<64x96xf32> to vector<64x32xf32>
    %18 = vector.extract_strided_slice %11 {offsets = [0, 32], sizes = [64, 32], strides = [1, 1]} : vector<64x64xf32> to vector<64x32xf32>
    %19 = arith.addf %17, %18 : vector<64x32xf32>
    %20 = vector.extract_strided_slice %9 {offsets = [0, 64], sizes = [64, 32], strides = [1, 1]} : vector<64x96xf32> to vector<64x32xf32>
    %21 = vector.extract_strided_slice %16 {offsets = [0, 0], sizes = [64, 8], strides = [1, 1]} : vector<64x32xf32> to vector<64x8xf32>
    %22 = vector.extract_strided_slice %19 {offsets = [0, 0], sizes = [64, 8], strides = [1, 1]} : vector<64x32xf32> to vector<64x8xf32>
    %cst_13 = arith.constant dense<0.000000e+00> : vector<64x64xf32>
    %23 = tpu.matmul %21, %22, %cst_13 {dimension_numbers = #tpu.dot_dimension_numbers<[1], [1], [0], [0], [0, 0, 1, 0], [], []>} : vector<64x8xf32>, vector<64x8xf32>, vector<64x64xf32> -> vector<64x64xf32>
    %24 = vector.broadcast %4 : vector<1x64xf32> to vector<64x64xf32>
    %25 = arith.addf %23, %24 : vector<64x64xf32>
    %cst_14 = arith.constant dense<0xFF800000> : vector<64xf32>
    %26 = vector.multi_reduction <maximumf>, %25, %cst_14 [1] : vector<64x64xf32> to vector<64xf32>
    %27 = vector.shape_cast %26 : vector<64xf32> to vector<64x1xf32>
    %28 = vector.broadcast %27 : vector<64x1xf32> to vector<64x64xf32>
    %29 = arith.subf %25, %28 : vector<64x64xf32>
    %30 = math.exp %29 : vector<64x64xf32>
    %cst_15 = arith.constant dense<0.000000e+00> : vector<64xf32>
    %31 = vector.multi_reduction <add>, %30, %cst_15 [1] : vector<64x64xf32> to vector<64xf32>
    %32 = vector.shape_cast %31 : vector<64xf32> to vector<64x1xf32>
    %33 = tpu.reciprocal %32 {approx = true} : vector<64x1xf32> -> vector<64x1xf32>
    %34 = vector.broadcast %33 : vector<64x1xf32> to vector<64x64xf32>
    %35 = arith.mulf %30, %34 : vector<64x64xf32>
    %36 = vector.extract_strided_slice %20 {offsets = [0, 0], sizes = [64, 8], strides = [1, 1]} : vector<64x32xf32> to vector<64x8xf32>
    %cst_16 = arith.constant dense<0.000000e+00> : vector<64x8xf32>
    %37 = tpu.matmul %35, %36, %cst_16 {dimension_numbers = #tpu.dot_dimension_numbers<[1], [0], [0], [1], [0, 0, 1, 1], [], []>} : vector<64x64xf32>, vector<64x8xf32>, vector<64x8xf32> -> vector<64x8xf32>
    %38 = vector.extract_strided_slice %16 {offsets = [0, 8], sizes = [64, 8], strides = [1, 1]} : vector<64x32xf32> to vector<64x8xf32>
    %39 = vector.extract_strided_slice %19 {offsets = [0, 8], sizes = [64, 8], strides = [1, 1]} : vector<64x32xf32> to vector<64x8xf32>
    %cst_17 = arith.constant dense<0.000000e+00> : vector<64x64xf32>
    %40 = tpu.matmul %38, %39, %cst_17 {dimension_numbers = #tpu.dot_dimension_numbers<[1], [1], [0], [0], [0, 0, 1, 0], [], []>} : vector<64x8xf32>, vector<64x8xf32>, vector<64x64xf32> -> vector<64x64xf32>
    %41 = vector.broadcast %4 : vector<1x64xf32> to vector<64x64xf32>
    %42 = arith.addf %40, %41 : vector<64x64xf32>
    %cst_18 = arith.constant dense<0xFF800000> : vector<64xf32>
    %43 = vector.multi_reduction <maximumf>, %42, %cst_18 [1] : vector<64x64xf32> to vector<64xf32>
    %44 = vector.shape_cast %43 : vector<64xf32> to vector<64x1xf32>
    %45 = vector.broadcast %44 : vector<64x1xf32> to vector<64x64xf32>
    %46 = arith.subf %42, %45 : vector<64x64xf32>
    %47 = math.exp %46 : vector<64x64xf32>
    %cst_19 = arith.constant dense<0.000000e+00> : vector<64xf32>
    %48 = vector.multi_reduction <add>, %47, %cst_19 [1] : vector<64x64xf32> to vector<64xf32>
    %49 = vector.shape_cast %48 : vector<64xf32> to vector<64x1xf32>
    %50 = tpu.reciprocal %49 {approx = true} : vector<64x1xf32> -> vector<64x1xf32>
    %51 = vector.broadcast %50 : vector<64x1xf32> to vector<64x64xf32>
    %52 = arith.mulf %47, %51 : vector<64x64xf32>
    %53 = vector.extract_strided_slice %20 {offsets = [0, 8], sizes = [64, 8], strides = [1, 1]} : vector<64x32xf32> to vector<64x8xf32>
    %cst_20 = arith.constant dense<0.000000e+00> : vector<64x8xf32>
    %54 = tpu.matmul %52, %53, %cst_20 {dimension_numbers = #tpu.dot_dimension_numbers<[1], [0], [0], [1], [0, 0, 1, 1], [], []>} : vector<64x64xf32>, vector<64x8xf32>, vector<64x8xf32> -> vector<64x8xf32>
    %55 = vector.extract_strided_slice %16 {offsets = [0, 16], sizes = [64, 8], strides = [1, 1]} : vector<64x32xf32> to vector<64x8xf32>
    %56 = vector.extract_strided_slice %19 {offsets = [0, 16], sizes = [64, 8], strides = [1, 1]} : vector<64x32xf32> to vector<64x8xf32>
    %cst_21 = arith.constant dense<0.000000e+00> : vector<64x64xf32>
    %57 = tpu.matmul %55, %56, %cst_21 {dimension_numbers = #tpu.dot_dimension_numbers<[1], [1], [0], [0], [0, 0, 1, 0], [], []>} : vector<64x8xf32>, vector<64x8xf32>, vector<64x64xf32> -> vector<64x64xf32>
    %58 = vector.broadcast %4 : vector<1x64xf32> to vector<64x64xf32>
    %59 = arith.addf %57, %58 : vector<64x64xf32>
    %cst_22 = arith.constant dense<0xFF800000> : vector<64xf32>
    %60 = vector.multi_reduction <maximumf>, %59, %cst_22 [1] : vector<64x64xf32> to vector<64xf32>
    %61 = vector.shape_cast %60 : vector<64xf32> to vector<64x1xf32>
    %62 = vector.broadcast %61 : vector<64x1xf32> to vector<64x64xf32>
    %63 = arith.subf %59, %62 : vector<64x64xf32>
    %64 = math.exp %63 : vector<64x64xf32>
    %cst_23 = arith.constant dense<0.000000e+00> : vector<64xf32>
    %65 = vector.multi_reduction <add>, %64, %cst_23 [1] : vector<64x64xf32> to vector<64xf32>
    %66 = vector.shape_cast %65 : vector<64xf32> to vector<64x1xf32>
    %67 = tpu.reciprocal %66 {approx = true} : vector<64x1xf32> -> vector<64x1xf32>
    %68 = vector.broadcast %67 : vector<64x1xf32> to vector<64x64xf32>
    %69 = arith.mulf %64, %68 : vector<64x64xf32>
    %70 = vector.extract_strided_slice %20 {offsets = [0, 16], sizes = [64, 8], strides = [1, 1]} : vector<64x32xf32> to vector<64x8xf32>
    %cst_24 = arith.constant dense<0.000000e+00> : vector<64x8xf32>
    %71 = tpu.matmul %69, %70, %cst_24 {dimension_numbers = #tpu.dot_dimension_numbers<[1], [0], [0], [1], [0, 0, 1, 1], [], []>} : vector<64x64xf32>, vector<64x8xf32>, vector<64x8xf32> -> vector<64x8xf32>
    %72 = vector.extract_strided_slice %16 {offsets = [0, 24], sizes = [64, 8], strides = [1, 1]} : vector<64x32xf32> to vector<64x8xf32>
    %73 = vector.extract_strided_slice %19 {offsets = [0, 24], sizes = [64, 8], strides = [1, 1]} : vector<64x32xf32> to vector<64x8xf32>
    %cst_25 = arith.constant dense<0.000000e+00> : vector<64x64xf32>
    %74 = tpu.matmul %72, %73, %cst_25 {dimension_numbers = #tpu.dot_dimension_numbers<[1], [1], [0], [0], [0, 0, 1, 0], [], []>} : vector<64x8xf32>, vector<64x8xf32>, vector<64x64xf32> -> vector<64x64xf32>
    %75 = vector.broadcast %4 : vector<1x64xf32> to vector<64x64xf32>
    %76 = arith.addf %74, %75 : vector<64x64xf32>
    %cst_26 = arith.constant dense<0xFF800000> : vector<64xf32>
    %77 = vector.multi_reduction <maximumf>, %76, %cst_26 [1] : vector<64x64xf32> to vector<64xf32>
    %78 = vector.shape_cast %77 : vector<64xf32> to vector<64x1xf32>
    %79 = vector.broadcast %78 : vector<64x1xf32> to vector<64x64xf32>
    %80 = arith.subf %76, %79 : vector<64x64xf32>
    %81 = math.exp %80 : vector<64x64xf32>
    %cst_27 = arith.constant dense<0.000000e+00> : vector<64xf32>
    %82 = vector.multi_reduction <add>, %81, %cst_27 [1] : vector<64x64xf32> to vector<64xf32>
    %83 = vector.shape_cast %82 : vector<64xf32> to vector<64x1xf32>
    %84 = tpu.reciprocal %83 {approx = true} : vector<64x1xf32> -> vector<64x1xf32>
    %85 = vector.broadcast %84 : vector<64x1xf32> to vector<64x64xf32>
    %86 = arith.mulf %81, %85 : vector<64x64xf32>
    %87 = vector.extract_strided_slice %20 {offsets = [0, 24], sizes = [64, 8], strides = [1, 1]} : vector<64x32xf32> to vector<64x8xf32>
    %cst_28 = arith.constant dense<0.000000e+00> : vector<64x8xf32>
    %88 = tpu.matmul %86, %87, %cst_28 {dimension_numbers = #tpu.dot_dimension_numbers<[1], [0], [0], [1], [0, 0, 1, 1], [], []>} : vector<64x64xf32>, vector<64x8xf32>, vector<64x8xf32> -> vector<64x8xf32>
    %89 = tpu.concatenate %37, %54, %71, %88 in 1 : vector<64x8xf32>, vector<64x8xf32>, vector<64x8xf32>, vector<64x8xf32> -> vector<64x32xf32>
    %c0_29 = arith.constant 0 : index
    %c0_30 = arith.constant 0 : index
    %90 = vector.load %arg6[%c0_29, %c0_30] : memref<32x32xf32, #tpu.memory_space<vmem>>, vector<32x32xf32>
    %cst_31 = arith.constant dense<0.000000e+00> : vector<64x32xf32>
    %91 = tpu.matmul %89, %90, %cst_31 {dimension_numbers = #tpu.dot_dimension_numbers<[1], [0], [0], [1], [0, 0, 1, 1], [], []>} : vector<64x32xf32>, vector<32x32xf32>, vector<64x32xf32> -> vector<64x32xf32>
    %c0_32 = arith.constant 0 : index
    %c0_33 = arith.constant 0 : index
    %92 = vector.load %arg7[%c0_32, %c0_33] : memref<1x32xf32, #tpu.memory_space<vmem>>, vector<1x32xf32>
    %93 = vector.broadcast %92 : vector<1x32xf32> to vector<64x32xf32>
    %94 = arith.addf %91, %93 : vector<64x32xf32>
    %95 = arith.addf %1, %94 : vector<64x32xf32>
    %c0_34 = arith.constant 0 : index
    %c0_35 = arith.constant 0 : index
    %96 = vector.load %arg8[%c0_34, %c0_35] : memref<4x32xf32, #tpu.memory_space<vmem>>, vector<1x32xf32>
    %c1 = arith.constant 1 : index
    %c0_36 = arith.constant 0 : index
    %97 = vector.load %arg8[%c1, %c0_36] : memref<4x32xf32, #tpu.memory_space<vmem>>, vector<1x32xf32>
    %cst_37 = arith.constant dense<0.000000e+00> : vector<64xf32>
    %98 = vector.multi_reduction <add>, %95, %cst_37 [1] : vector<64x32xf32> to vector<64xf32>
    %99 = vector.shape_cast %98 : vector<64xf32> to vector<64x1xf32>
    %cst_38 = arith.constant 3.200000e+01 : f32
    %100 = vector.broadcast %cst_38 : f32 to vector<64x1xf32>
    %101 = arith.divf %99, %100 : vector<64x1xf32>
    %102 = vector.broadcast %101 : vector<64x1xf32> to vector<64x32xf32>
    %103 = arith.subf %95, %102 : vector<64x32xf32>
    %104 = arith.mulf %103, %103 : vector<64x32xf32>
    %cst_39 = arith.constant dense<0.000000e+00> : vector<64xf32>
    %105 = vector.multi_reduction <add>, %104, %cst_39 [1] : vector<64x32xf32> to vector<64xf32>
    %106 = vector.shape_cast %105 : vector<64xf32> to vector<64x1xf32>
    %cst_40 = arith.constant 3.200000e+01 : f32
    %107 = vector.broadcast %cst_40 : f32 to vector<64x1xf32>
    %108 = arith.divf %106, %107 : vector<64x1xf32>
    %109 = vector.broadcast %101 : vector<64x1xf32> to vector<64x32xf32>
    %110 = arith.subf %95, %109 : vector<64x32xf32>
    %cst_41 = arith.constant 9.99999974E-6 : f32
    %111 = vector.broadcast %cst_41 : f32 to vector<64x1xf32>
    %112 = arith.addf %108, %111 : vector<64x1xf32>
    %113 = math.rsqrt %112 : vector<64x1xf32>
    %114 = vector.broadcast %113 : vector<64x1xf32> to vector<64x32xf32>
    %115 = arith.mulf %110, %114 : vector<64x32xf32>
    %116 = vector.broadcast %96 : vector<1x32xf32> to vector<64x32xf32>
    %117 = arith.mulf %115, %116 : vector<64x32xf32>
    %118 = vector.broadcast %97 : vector<1x32xf32> to vector<64x32xf32>
    %119 = arith.addf %117, %118 : vector<64x32xf32>
    %c0_42 = arith.constant 0 : index
    %c0_43 = arith.constant 0 : index
    %120 = vector.load %arg9[%c0_42, %c0_43] : memref<32x64xf32, #tpu.memory_space<vmem>>, vector<32x64xf32>
    %cst_44 = arith.constant dense<0.000000e+00> : vector<64x64xf32>
    %121 = tpu.matmul %119, %120, %cst_44 {dimension_numbers = #tpu.dot_dimension_numbers<[1], [0], [0], [1], [0, 0, 1, 1], [], []>} : vector<64x32xf32>, vector<32x64xf32>, vector<64x64xf32> -> vector<64x64xf32>
    %c0_45 = arith.constant 0 : index
    %c0_46 = arith.constant 0 : index
    %122 = vector.load %arg10[%c0_45, %c0_46] : memref<1x64xf32, #tpu.memory_space<vmem>>, vector<1x64xf32>
    %123 = vector.broadcast %122 : vector<1x64xf32> to vector<64x64xf32>
    %124 = arith.addf %121, %123 : vector<64x64xf32>
    %cst_47 = arith.constant 0.000000e+00 : f32
    %125 = vector.broadcast %cst_47 : f32 to vector<64x64xf32>
    %126 = arith.maximumf %124, %125 : vector<64x64xf32>
    %c0_48 = arith.constant 0 : index
    %c0_49 = arith.constant 0 : index
    %127 = vector.load %arg11[%c0_48, %c0_49] : memref<64x32xf32, #tpu.memory_space<vmem>>, vector<64x32xf32>
    %cst_50 = arith.constant dense<0.000000e+00> : vector<64x32xf32>
    %128 = tpu.matmul %126, %127, %cst_50 {dimension_numbers = #tpu.dot_dimension_numbers<[1], [0], [0], [1], [0, 0, 1, 1], [], []>} : vector<64x64xf32>, vector<64x32xf32>, vector<64x32xf32> -> vector<64x32xf32>
    %c0_51 = arith.constant 0 : index
    %c0_52 = arith.constant 0 : index
    %129 = vector.load %arg12[%c0_51, %c0_52] : memref<1x32xf32, #tpu.memory_space<vmem>>, vector<1x32xf32>
    %130 = vector.broadcast %129 : vector<1x32xf32> to vector<64x32xf32>
    %131 = arith.addf %128, %130 : vector<64x32xf32>
    %132 = arith.addf %119, %131 : vector<64x32xf32>
    %c2 = arith.constant 2 : index
    %c0_53 = arith.constant 0 : index
    %133 = vector.load %arg8[%c2, %c0_53] : memref<4x32xf32, #tpu.memory_space<vmem>>, vector<1x32xf32>
    %c3 = arith.constant 3 : index
    %c0_54 = arith.constant 0 : index
    %134 = vector.load %arg8[%c3, %c0_54] : memref<4x32xf32, #tpu.memory_space<vmem>>, vector<1x32xf32>
    %cst_55 = arith.constant dense<0.000000e+00> : vector<64xf32>
    %135 = vector.multi_reduction <add>, %132, %cst_55 [1] : vector<64x32xf32> to vector<64xf32>
    %136 = vector.shape_cast %135 : vector<64xf32> to vector<64x1xf32>
    %cst_56 = arith.constant 3.200000e+01 : f32
    %137 = vector.broadcast %cst_56 : f32 to vector<64x1xf32>
    %138 = arith.divf %136, %137 : vector<64x1xf32>
    %139 = vector.broadcast %138 : vector<64x1xf32> to vector<64x32xf32>
    %140 = arith.subf %132, %139 : vector<64x32xf32>
    %141 = arith.mulf %140, %140 : vector<64x32xf32>
    %cst_57 = arith.constant dense<0.000000e+00> : vector<64xf32>
    %142 = vector.multi_reduction <add>, %141, %cst_57 [1] : vector<64x32xf32> to vector<64xf32>
    %143 = vector.shape_cast %142 : vector<64xf32> to vector<64x1xf32>
    %cst_58 = arith.constant 3.200000e+01 : f32
    %144 = vector.broadcast %cst_58 : f32 to vector<64x1xf32>
    %145 = arith.divf %143, %144 : vector<64x1xf32>
    %146 = vector.broadcast %138 : vector<64x1xf32> to vector<64x32xf32>
    %147 = arith.subf %132, %146 : vector<64x32xf32>
    %cst_59 = arith.constant 9.99999974E-6 : f32
    %148 = vector.broadcast %cst_59 : f32 to vector<64x1xf32>
    %149 = arith.addf %145, %148 : vector<64x1xf32>
    %150 = math.rsqrt %149 : vector<64x1xf32>
    %151 = vector.broadcast %150 : vector<64x1xf32> to vector<64x32xf32>
    %152 = arith.mulf %147, %151 : vector<64x32xf32>
    %153 = vector.broadcast %133 : vector<1x32xf32> to vector<64x32xf32>
    %154 = arith.mulf %152, %153 : vector<64x32xf32>
    %155 = vector.broadcast %134 : vector<1x32xf32> to vector<64x32xf32>
    %156 = arith.addf %154, %155 : vector<64x32xf32>
    %c0_60 = arith.constant 0 : index
    %c0_61 = arith.constant 0 : index
    %c0_62 = arith.constant 0 : index
    %157 = vector.load %arg13[%c0_60, %c0_61, %c0_62] : memref<1x64x32xf32, #tpu.memory_space<vmem>>, vector<1x64x32xf32>
    %158 = vector.shape_cast %157 : vector<1x64x32xf32> to vector<64x32xf32>
    %159 = vector.shape_cast %156 : vector<64x32xf32> to vector<1x64x32xf32>
    tpu.vector_store %arg13[%c0_60, %c0_61, %c0_62], %159 {strides = array<i32>} : memref<1x64x32xf32, #tpu.memory_space<vmem>>, vector<1x64x32xf32>,
    return
  }
  func.func @transform_0(%arg0: i32) -> (i32, i32, i32) {
    %c0_i32 = arith.constant 0 : i32
    %c0_i32_0 = arith.constant 0 : i32
    %c0_i32_1 = arith.constant 0 : i32
    return %arg0, %c0_i32, %c0_i32_0 : i32, i32, i32
  }
  func.func @transform_1(%arg0: i32) -> (i32, i32) {
    %c0_i32 = arith.constant 0 : i32
    %c0_i32_0 = arith.constant 0 : i32
    %c0_i32_1 = arith.constant 0 : i32
    return %c0_i32, %c0_i32_0 : i32, i32
  }
  func.func @transform_2(%arg0: i32) -> (i32, i32, i32) {
    %c0_i32 = arith.constant 0 : i32
    %c0_i32_0 = arith.constant 0 : i32
    %c0_i32_1 = arith.constant 0 : i32
    return %arg0, %c0_i32, %c0_i32_0 : i32, i32, i32
  }
  func.func @transform_3(%arg0: i32) -> (i32, i32) {
    %c0_i32 = arith.constant 0 : i32
    %c0_i32_0 = arith.constant 0 : i32
    %c0_i32_1 = arith.constant 0 : i32
    return %c0_i32, %c0_i32_0 : i32, i32
  }
  func.func @transform_4(%arg0: i32) -> (i32, i32) {
    %c0_i32 = arith.constant 0 : i32
    %c0_i32_0 = arith.constant 0 : i32
    %c0_i32_1 = arith.constant 0 : i32
    return %c0_i32, %c0_i32_0 : i32, i32
  }
  func.func @transform_5(%arg0: i32) -> (i32, i32) {
    %c0_i32 = arith.constant 0 : i32
    %c0_i32_0 = arith.constant 0 : i32
    %c0_i32_1 = arith.constant 0 : i32
    return %c0_i32, %c0_i32_0 : i32, i32
  }
  func.func @transform_6(%arg0: i32) -> (i32, i32) {
    %c0_i32 = arith.constant 0 : i32
    %c0_i32_0 = arith.constant 0 : i32
    %c0_i32_1 = arith.constant 0 : i32
    return %c0_i32, %c0_i32_0 : i32, i32
  }
  func.func @transform_7(%arg0: i32) -> (i32, i32) {
    %c0_i32 = arith.constant 0 : i32
    %c0_i32_0 = arith.constant 0 : i32
    %c0_i32_1 = arith.constant 0 : i32
    return %c0_i32, %c0_i32_0 : i32, i32
  }
  func.func @transform_8(%arg0: i32) -> (i32, i32) {
    %c0_i32 = arith.constant 0 : i32
    %c0_i32_0 = arith.constant 0 : i32
    %c0_i32_1 = arith.constant 0 : i32
    return %c0_i32, %c0_i32_0 : i32, i32
  }
  func.func @transform_9(%arg0: i32) -> (i32, i32) {
    %c0_i32 = arith.constant 0 : i32
    %c0_i32_0 = arith.constant 0 : i32
    %c0_i32_1 = arith.constant 0 : i32
    return %c0_i32, %c0_i32_0 : i32, i32
  }
  func.func @transform_10(%arg0: i32) -> (i32, i32) {
    %c0_i32 = arith.constant 0 : i32
    %c0_i32_0 = arith.constant 0 : i32
    %c0_i32_1 = arith.constant 0 : i32
    return %c0_i32, %c0_i32_0 : i32, i32
  }
  func.func @transform_11(%arg0: i32) -> (i32, i32) {
    %c0_i32 = arith.constant 0 : i32
    %c0_i32_0 = arith.constant 0 : i32
    %c0_i32_1 = arith.constant 0 : i32
    return %c0_i32, %c0_i32_0 : i32, i32
  }
  func.func @transform_12(%arg0: i32) -> (i32, i32, i32) {
    %c0_i32 = arith.constant 0 : i32
    %c0_i32_0 = arith.constant 0 : i32
    %c0_i32_1 = arith.constant 0 : i32
    return %arg0, %c0_i32, %c0_i32_0 : i32, i32, i32
  }
}

</mosaic_0001>

<bundles_post_ra>
// kernel: tpu_custom_call.1
= control target key start
LH: loop header
LB: loop body
LE: loop exit
PB: predicated region body
PF: predicated region fallthrough
CT: control target
= control target key end

     0   :  { %s4626_s21 = smov 0   ;;  %s5570_s0 = inlined_call_operand.vmem [shape: f32[2,64,32], index: 0, kind: input, shape index: {}]   ;;  %s5571_s1 = inlined_call_operand.vmem [shape: f32[64,32], index: 1, kind: input, shape index: {}]   ;;  %s5572_s2 = inlined_call_operand.vmem [shape: f32[2,1,64], index: 2, kind: input, shape index: {}]   ;;  %s5573_s3 = inlined_call_operand.vmem [shape: f32[32,96], index: 3, kind: input, shape index: {}]   ;;  %s5574_s4 = inlined_call_operand.vmem [shape: f32[1,96], index: 4, kind: input, shape index: {}]   ;;  %s5575_s5 = inlined_call_operand.vmem [shape: f32[32,32], index: 5, kind: input, shape index: {}]   ;;  %s5576_s6 = inlined_call_operand.vmem [shape: f32[1,32], index: 6, kind: input, shape index: {}]   ;;  %s5577_s7 = inlined_call_operand.vmem [shape: f32[4,32], index: 7, kind: input, shape index: {}]   ;;  %s5578_s8 = inlined_call_operand.vmem [shape: f32[32,64], index: 8, kind: input, shape index: {}]   ;;  %s5579_s9 = inlined_call_operand.vmem [shape: f32[1,64], index: 9, kind: input, shape index: {}]   ;;  %s5580_s10 = inlined_call_operand.vmem [shape: f32[64,32], index: 10, kind: input, shape index: {}]   ;;  %s5581_s11 = inlined_call_operand.vmem [shape: f32[1,32], index: 11, kind: input, shape index: {}]   ;;  %s5582_s12 = inlined_call_operand.vmem [shape: f32[2,64,32], index: 12, kind: output, shape index: {}]  }
   0x1 LB: > { %s3290_s22 = sadd.s32 4294967295, %s4545_s21   ;;  %p3294_p0 = scmp.ge.s32.totalorder %s4545_s21, 1  ;;  %s4545_s21 = sphi %s4626_s21, %s22_s21  }
   0x2   : > { %p370_p1 = scmp.lt.s32.totalorder %s4545_s21, 3 }
   0x4   : > { %p371_p2 = pnand %p3294_p0, %p370_p1 }
   0x5   : > { %v445_v0 = vld [vmem:[%s5573_s3] sm:$0xff] (!%p371_p2)  ;;  %v446_v1 = vld [vmem:[%s5573_s3 + $0x8] sm:$0xff] (!%p371_p2)  ;;  %v447_v2 = vld [vmem:[%s5573_s3 + $0x10] sm:$0xff] (!%p371_p2)  ;;  %p415_p3 = scmp.lt.s32.totalorder (!%p371_p2), %s3290_s22, 1  ;;  %vm456_vm0 = vcmask (!%p371_p2), 261120   ;;  %vm761_vm1 = vcmask (!%p371_p2), 64512  }
   0x6   : > { %374 = sbr.rel (%p371_p2) target bundleno = 4530 (0x11b2), region = 68  ;;  %v3972_v3 = vpack.c.bf16 (!%p371_p2), %v446_v1, %v445_v0  ;;  %v448_v4 = vld [vmem:[%s5573_s3 + $0x18] sm:$0xff] (!%p371_p2)  ;;  %v436_v5 = vld [vmem:[%s5571_s1] sm:$0xff] (!%p371_p2)  ;;  %v437_v9 = vld [vmem:[%s5571_s1 + $0x8] sm:$0xff] (!%p371_p2)  ;;  %s4547_s23 = smov (!%p371_p2), 96   ;;  %vm907_vm3 = vcmask (!%p371_p2), 523264  }
   0x7   : > { %v3976_v6 = vpack.c.bf16 (!%p371_p2), %v448_v4, %v447_v2  ;;  %3668 = vmatprep.mubr.msk.f32.mxu1 (!%p371_p2), %vm456_vm0, %v436_v5  ;;  %v438_v11 = vld [vmem:[%s5571_s1 + $0x10] sm:$0xff] (!%p371_p2)  ;;  %v439_v13 = vld [vmem:[%s5571_s1 + $0x18] sm:$0xff] (!%p371_p2)  ;;  %v440_v15 = vld [vmem:[%s5571_s1 + $0x20] sm:$0xff] (!%p371_p2)  ;;  %s4548_s27 = smov (!%p371_p2), 64   ;;  %s4549_s28 = smov (!%p371_p2), 88   ;;  %vm2491_vm4 = vcmask (!%p371_p2), 130048  }
   0x8   : > { %3973 = vmatprep.subr.bf16.mxu0 (!%p371_p2), %v3972_v3  ;;  %3981 = vmatprep.subr.bf16.mxu1 (!%p371_p2), %v3972_v3  ;;  %v441_v17 = vld [vmem:[%s5571_s1 + $0x28] sm:$0xff] (!%p371_p2)  ;;  %v442_v19 = vld [vmem:[%s5571_s1 + $0x30] sm:$0xff] (!%p371_p2)  ;;  %v443_v21 = vld [vmem:[%s5571_s1 + $0x38] sm:$0xff] (!%p371_p2)  ;;  %s4550_s29 = smov (!%p371_p2), 120   ;;  %s4551_s30 = smov (!%p371_p2), 56   ;;  %vm2500_vm5 = vcmask (!%p371_p2), 195584  }
   0x9   : > { %3975 = vmatpush3.bf16.msra.mxu0 (!%p371_p2), %v3972_v3  ;;  %3983 = vmatpush3.bf16.msra.mxu1 (!%p371_p2), %v3972_v3  ;;  %v3299_v22 = vld [vmem:[%s5574_s4] ss:$0 sm:$0xff] (!%p371_p2)  ;;  %vm4736_vm2 = vmpackc.low (!%p371_p2), %vm761_vm1, %vm761_vm1  ;;  %s4552_s13 = smov (!%p371_p2), 80   ;;  %s4553_s14 = smov (!%p371_p2), 112  }
   0xa   : > { %3977 = vmatprep.subr.bf16.mxu0 (!%p371_p2), %v3976_v6  ;;  %3985 = vmatprep.subr.bf16.mxu1 (!%p371_p2), %v3976_v6  ;;  %s4554_s16 = smov (!%p371_p2), 48   ;;  %s4555_s17 = smov (!%p371_p2), 72  }
   0xb   : > { %s4556_s19 = smov (!%p371_p2), 104   ;;  %s4557_s20 = smov (!%p371_p2), 40  }
   0xc   : > { %s4559_s24 = smov (!%p371_p2), 16  }
   0xd   : > { %s5586_s22 = smov (!%p415_p3, %s3290_s22), 1  ;;  %3979 = vmatpush3.bf16.msra.mxu0 %v3976_v6  ;;  %3987 = vmatpush3.bf16.msra.mxu1 %v3976_v6 }
   0xe   : > { %s3446_s15 = sshll.u32 %s5586_s22, 6  ;;  %s4789_s26 = scalar_lea.vmem %s5572_s2, %s5586_s22 }
   0xf   : > { %s4658_s18 = scalar_lea.vmem %s5570_s0, %s3446_s15 }
  0x10   : > { %v428_v7 = vld [vmem:[%s4658_s18] sm:$0xff]  ;;  %v429_v8 = vld [vmem:[%s4658_s18 + $0x8] sm:$0xff]  ;;  %v430_v10 = vld [vmem:[%s4658_s18 + $0x10] sm:$0xff]  ;;  %3669 = vmatmul.mubr.msk.f32.vlgmr.msra.gmra.mrb[0].mxu1 %vm456_vm0, %v437_v9 }
  0x11   : > { %3648 = vmatprep.mubr.msk.f32.mxu0 %vm456_vm0, %v428_v7  ;;  %v431_v12 = vld [vmem:[%s4658_s18 + $0x18] sm:$0xff]  ;;  %3671 = vmatprep.mubr.msk.f32.mxu1 %vm456_vm0, %v438_v11  ;;  %v432_v14 = vld [vmem:[%s4658_s18 + $0x20] sm:$0xff]  ;;  %v433_v16 = vld [vmem:[%s4658_s18 + $0x28] sm:$0xff] }
  0x12   : > { %3649 = vmatmul.mubr.msk.f32.vlgmr.msra.gmra.mrb[0].mxu0 %vm456_vm0, %v429_v8  ;;  %v434_v18 = vld [vmem:[%s4658_s18 + $0x30] sm:$0xff]  ;;  %v435_v20 = vld [vmem:[%s4658_s18 + $0x38] sm:$0xff] }
  0x13   : > { %3651 = vmatprep.mubr.msk.f32.mxu0 %vm456_vm0, %v430_v10 }
  0x14   : > { %3672 = vmatmul.mubr.msk.f32.gmra.mrb[2].mxu1 %vm456_vm0, %v439_v13 }
  0x15   : > { %3674 = vmatprep.mubr.msk.f32.mxu1 %vm456_vm0, %v440_v15 }
  0x16   : > { %3652 = vmatmul.mubr.msk.f32.gmra.mrb[2].mxu0 %vm456_vm0, %v431_v12 }
  0x17   : > { %3654 = vmatprep.mubr.msk.f32.mxu0 %vm456_vm0, %v432_v14 }
  0x18   : > { %3675 = vmatmul.mubr.msk.f32.gmra.mrb[4].mxu1 %vm456_vm0, %v441_v17 }
  0x19   : > { %3677 = vmatprep.mubr.msk.f32.mxu1 %vm456_vm0, %v442_v19 }
  0x1a   : > { %3655 = vmatmul.mubr.msk.f32.gmra.mrb[4].mxu0 %vm456_vm0, %v433_v16 }
  0x1b   : > { %3657 = vmatprep.mubr.msk.f32.mxu0 %vm456_vm0, %v434_v18 }
  0x1c   : > { %3678 = vmatmul.mubr.msk.f32.gmra.mrb[6].mxu1 %vm456_vm0, %v443_v21 }
  0x1e   : > { %3658 = vmatmul.mubr.msk.f32.gmra.mrb[6].mxu0 %vm456_vm0, %v435_v20 }
  0xe3   : > { %v3670_v24 = vpop.f32.mrb[0].mxu1 }
  0xe4   : > { %v676_v27 = vpop.f32.mrb[1].mxu1 }
  0xe5   : > { %v3650_v23 = vpop.f32.mrb[0].mxu0 }
  0xe6   : > { %v553_v25 = vadd.f32 %v3650_v23, %v3299_v22  ;;  %v547_v26 = vpop.f32.mrb[1].mxu0 }
  0xe7   : > { %v548_v28 = vadd.f32 %v3299_v22, %v547_v26  ;;  %v3673_v32 = vpop.f32.mrb[2].mxu1 }
  0xe8   : > { %v4707_v29 = vadd.f32 %v3670_v24, %v553_v25  ;;  %v686_v36 = vpop.f32.mrb[3].mxu1  ;;  %v4792_v24 = vld [vmem:[%s4789_s26] ss:$0 sm:$0xff] }
  0xe9   : > { %v715_v30 = vadd.f32 %v676_v27, %v548_v28  ;;  %v3653_v31 = vpop.f32.mrb[2].mxu0  ;;  %v4709_v33 = vpack.i.bf16 %v553_v25, %v548_v28 }
  0xea   : > { %v563_v34 = vadd.f32 %v3653_v31, %v3299_v22  ;;  %v557_v35 = vpop.f32.mrb[3].mxu0  ;;  %v4757_v17 = vmul.f32 0.35355338, %v4707_v29 }
  0xeb   : > { %v558_v37 = vadd.f32 %v3299_v22, %v557_v35  ;;  %v4712_v38 = vpack.i.bf16 %v4707_v29, %v715_v30  ;;  %v4714_v39 = vmul.f32 0.35355338, %v715_v30  ;;  %v3676_v43 = vpop.f32.mrb[4].mxu1 }
  0xec   : > { %v718_v40 = vadd.f32 %v3673_v32, %v563_v34  ;;  %v696_v47 = vpop.f32.mrb[5].mxu1 }
  0xed   : > { %4211 = vrot.lane.b32.xlu0 %v4712_v38, %s4547_s23  ;;  %3696 = vmatprep.mubr.msk.f32.mxu0 %vm761_vm1, %v4714_v39  ;;  %v717_v41 = vadd.f32 %v686_v36, %v558_v37  ;;  %v3656_v42 = vpop.f32.mrb[4].mxu0  ;;  %v4719_v44 = vpack.i.bf16 %v563_v34, %v558_v37 }
  0xee   : > { %v573_v45 = vadd.f32 %v3656_v42, %v3299_v22  ;;  %v567_v46 = vpop.f32.mrb[5].mxu0  ;;  %v4765_v19 = vmul.f32 0.35355338, %v718_v40 }
  0xef   : > { %v4721_v48 = vpack.i.bf16 %v718_v40, %v717_v41  ;;  %v568_v49 = vadd.f32 %v3299_v22, %v567_v46  ;;  %v3679_v53 = vpop.f32.mrb[6].mxu1  ;;  %v4759_v18 = vmul.f32 0.35355338, %v717_v41 }
  0xf0   : > { %v720_v50 = vadd.f32 %v3676_v43, %v573_v45  ;;  %v706_v57 = vpop.f32.mrb[7].mxu1 }
  0xf1   : > { %4216 = vrot.lane.b32.xlu0 %v4721_v48, %s4547_s23  ;;  %v719_v51 = vadd.f32 %v696_v47, %v568_v49  ;;  %v3659_v52 = vpop.f32.mrb[6].mxu0  ;;  %v4724_v54 = vpack.i.bf16 %v573_v45, %v568_v49 }
  0xf2   : > { %v583_v55 = vadd.f32 %v3659_v52, %v3299_v22  ;;  %v577_v56 = vpop.f32.mrb[7].mxu0  ;;  %v4773_v21 = vmul.f32 0.35355338, %v720_v50 }
  0xf3   : > { %v4726_v58 = vpack.i.bf16 %v720_v50, %v719_v51  ;;  %v578_v59 = vadd.f32 %v3299_v22, %v577_v56  ;;  %v4767_v20 = vmul.f32 0.35355338, %v719_v51 }
  0xf4   : > { %v722_v60 = vadd.f32 %v3679_v53, %v583_v55 }
  0xf5   : > { %4221 = vrot.lane.b32.xlu1 %v4726_v58, %s4547_s23  ;;  %v721_v61 = vadd.f32 %v706_v57, %v578_v59  ;;  %v4729_v62 = vpack.i.bf16 %v583_v55, %v578_v59 }
  0xf6   : > { %v4781_v23 = vmul.f32 0.35355338, %v722_v60 }
  0xf7   : > { %v4731_v63 = vpack.i.bf16 %v722_v60, %v721_v61  ;;  %v4775_v22 = vmul.f32 0.35355338, %v721_v61 }
  0xf9   : > { %4226 = vrot.lane.b32.xlu1 %v4731_v63, %s4547_s23  ;;  %s4558_s23 = smov 8  }
 0x15f   : > { %v4212_v0 = vpop.permute.xlu0 %4211 }
 0x160   : > { %v4214_v1 = vunpack.i.h.bf16 %v4212_v0  ;;  %v4213_v2 = vunpack.i.l.bf16 %v4212_v0 }
 0x162   : > { %v3988_v4 = vpack.c.bf16 %v4214_v1, %v4213_v2 }
 0x163   : > { %v4217_v5 = vpop.permute.xlu0 %4216 }
 0x164   : > { %3990 = vmatprep.subr.msk.bf16.mxu0 %vm4736_vm2, %v3988_v4  ;;  %v4219_v6 = vunpack.i.h.bf16 %v4217_v5  ;;  %v4218_v7 = vunpack.i.l.bf16 %v4217_v5 }
 0x165   : > { %3993 = vmatpush3.bf16.xpose.msk.msra.mxu0 %vm4736_vm2, %v3988_v4 }
 0x166   : > { %v3994_v8 = vpack.c.bf16 %v4219_v6, %v4218_v7 }
 0x167   : > { %v4222_v9 = vpop.permute.xlu1 %4221 }
 0x168   : > { %3996 = vmatprep.subr.msk.bf16.mxu0 %vm4736_vm2, %v3994_v8  ;;  %v4224_v10 = vunpack.i.h.bf16 %v4222_v9  ;;  %v4223_v11 = vunpack.i.l.bf16 %v4222_v9 }
 0x16a   : > { %v4000_v12 = vpack.c.bf16 %v4224_v10, %v4223_v11 }
 0x16b   : > { %v4227_v13 = vpop.permute.xlu1 %4226 }
 0x16c   : > { %v4229_v14 = vunpack.i.h.bf16 %v4227_v13  ;;  %v4228_v15 = vunpack.i.l.bf16 %v4227_v13 }
 0x16d   : > { %3999 = vmatpush3.bf16.xpose.msk.msra.mxu0 %vm4736_vm2, %v3994_v8 }
 0x16e   : > { %4002 = vmatprep.subr.msk.bf16.mxu0 %vm4736_vm2, %v4000_v12  ;;  %v4006_v16 = vpack.c.bf16 %v4229_v14, %v4228_v15 }
 0x175   : > { %4005 = vmatpush3.bf16.xpose.msk.msra.mxu0 %vm4736_vm2, %v4000_v12 }
 0x176   : > { %4008 = vmatprep.subr.msk.bf16.mxu0 %vm4736_vm2, %v4006_v16 }
 0x17d   : > { %4011 = vmatpush3.bf16.xpose.msk.msra.mxu0 %vm4736_vm2, %v4006_v16 }
 0x184   : > { %3697 = vmatmul.mubr.msk.f32.vlgmr.msra.gmra.mrb[8].mxu0 %vm761_vm1, %v4757_v17 }
 0x185   : > { %3699 = vmatprep.mubr.msk.f32.mxu0 %vm761_vm1, %v4759_v18 }
 0x188   : > { %3700 = vmatmul.mubr.msk.f32.gmra.mrb[10].mxu0 %vm761_vm1, %v4765_v19 }
 0x189   : > { %3702 = vmatprep.mubr.msk.f32.mxu0 %vm761_vm1, %v4767_v20 }
 0x18c   : > { %3703 = vmatmul.mubr.msk.f32.gmra.mrb[12].mxu0 %vm761_vm1, %v4773_v21 }
 0x18d   : > { %3705 = vmatprep.mubr.msk.f32.mxu0 %vm761_vm1, %v4775_v22 }
 0x190   : > { %3706 = vmatmul.mubr.msk.f32.gmra.mrb[14].mxu0 %vm761_vm1, %v4781_v23 }
 0x257   : > { %v3698_v25 = vpop.f32.mrb[8].mxu0 }
 0x258   : > { %v874_v26 = vadd.f32 %v3698_v25, %v4792_v24  ;;  %v868_v27 = vpop.f32.mrb[9].mxu0 }
 0x259   : > { %v869_v28 = vadd.f32 %v4792_v24, %v868_v27 }
 0x25a   : > { %v911_v29 = vsel %vm907_vm3, %v874_v26, -inf }
 0x25b   : > { %912 = vmax.xlane.f32.xlu1 %v911_v29  ;;  %v3701_v30 = vpop.f32.mrb[10].mxu0  ;;  %v908_v31 = vsel %vm907_vm3, %v869_v28, -inf }
 0x25c   : > { %v4799_v32 = vadd.f32 %v3701_v30, %v4792_v24  ;;  %v878_v34 = vpop.f32.mrb[11].mxu0  ;;  %909 = vmax.xlane.f32.xlu0 %v908_v31 }
 0x25d   : > { %v879_v36 = vadd.f32 %v4792_v24, %v878_v34 }
 0x25e   : > { %v917_v35 = vsel %vm907_vm3, %v4799_v32, -inf }
 0x25f   : > { %v3704_v37 = vpop.f32.mrb[12].mxu0  ;;  %v914_v43 = vsel %vm907_vm3, %v879_v36, -inf }
 0x260   : > { %v888_v40 = vpop.f32.mrb[13].mxu0  ;;  %918 = vmax.xlane.f32.xlu0 %v917_v35  ;;  %v894_v41 = vadd.f32 %v3704_v37, %v4792_v24 }
 0x261   : > { %v889_v50 = vadd.f32 %v4792_v24, %v888_v40 }
 0x262   : > { %v923_v47 = vsel %vm907_vm3, %v894_v41, -inf }
 0x263   : > { %v3707_v42 = vpop.f32.mrb[14].mxu0  ;;  %v920_v51 = vsel %vm907_vm3, %v889_v50, -inf }
 0x264   : > { %v898_v45 = vpop.f32.mrb[15].mxu0  ;;  %915 = vmax.xlane.f32.xlu0 %v914_v43  ;;  %v4807_v46 = vadd.f32 %v3707_v42, %v4792_v24 }
 0x265   : > { %v4818_v52 = vadd.f32 %v4792_v24, %v898_v45 }
 0x266   : > { %v929_v49 = vsel %vm907_vm3, %v4807_v46, -inf }
 0x267   : > { %v926_v53 = vsel %vm907_vm3, %v4818_v52, -inf }
 0x268   : > { %924 = vmax.xlane.f32.xlu0 %v923_v47 }
 0x26c   : > { %4231 = vrot.lane.b32.xlu1 %v4709_v33, %s4548_s27  ;;  %930 = vmax.xlane.f32.xlu0 %v929_v49 }
 0x282   : > { %4236 = vrot.lane.b32.xlu0 %v4719_v44, %s4548_s27 }
 0x290   : > { %921 = vmax.xlane.f32.xlu1 %v920_v51 }
 0x2a1   : > { %4241 = vrot.lane.b32.xlu1 %v4724_v54, %s4548_s27 }
 0x2c5   : > { %927 = vmax.xlane.f32.xlu1 %v926_v53 }
 0x2d6   : > { %4246 = vrot.lane.b32.xlu1 %v4729_v62, %s4548_s27 }
 0x2e8   : > { %v913_v55 = vpop.xlane.xlu1 %912 }
 0x2e9   : > { %v933_v56 = vsub.f32 %v874_v26, %v913_v55  ;;  %v910_v57 = vpop.xlane.xlu0 %909 }
 0x2ea   : > { %v932_v59 = vsub.f32 %v869_v28, %v910_v57 }
 0x2eb   : > { %v942_v60 = vmul.f32 1.442695, %v933_v56 }
 0x2ec   : > { %v940_v61 = vmul.f32 1.442695, %v932_v59  ;;  %v4232_v0 = vpop.permute.xlu1 %4231 }
 0x2ed   : > { %4370 = vpow2.f32 %v942_v60  ;;  %v4234_v1 = vunpack.i.h.bf16 %v4232_v0  ;;  %v4233_v2 = vunpack.i.l.bf16 %v4232_v0  ;;  %v919_v4 = vpop.xlane.xlu0 %918 }
 0x2ee   : > { %4372 = vpow2.f32 %v940_v61  ;;  %v935_v35 = vsub.f32 %v4799_v32, %v919_v4 }
 0x2ef   : > { %v4012_v5 = vpack.c.bf16 %v4234_v1, %v4233_v2 }
 0x2f0   : > { %v946_v37 = vmul.f32 1.442695, %v935_v35 }
 0x2f1   : > { %4013 = vmatprep.subr.bf16.mxu1 %v4012_v5  ;;  %v916_v6 = vpop.xlane.xlu0 %915 }
 0x2f2   : > { %v934_v7 = vsub.f32 %v879_v36, %v916_v6  ;;  %4015 = vmatpush3.bf16.msra.mxu1 %v4012_v5 }
 0x2f4   : > { %v944_v8 = vmul.f32 1.442695, %v934_v7 }
 0x2f5   : > { %v925_v9 = vpop.xlane.xlu0 %924 }
 0x2f6   : > { %4374 = vpow2.f32 %v944_v8  ;;  %v937_v10 = vsub.f32 %v894_v41, %v925_v9 }
 0x2f7   : > { %v4823_v11 = vpop.eup %4370 }
 0x2f8   : > { %v4825_v12 = vpop.eup %4372  ;;  %v950_v13 = vmul.f32 1.442695, %v937_v10  ;;  %v959_v14 = vsel %vm907_vm3, %v4823_v11, 0.0 }
 0x2f9   : > { %960 = vadd.xlane.f32.xlu0 %v959_v14  ;;  %v931_v15 = vpop.xlane.xlu0 %930  ;;  %v956_v16 = vsel %vm907_vm3, %v4825_v12, 0.0 }
 0x2fa   : > { %4376 = vpow2.f32 %v950_v13  ;;  %957 = vadd.xlane.f32.xlu1 %v956_v16  ;;  %v939_v36 = vsub.f32 %v4807_v46, %v931_v15 }
 0x2fb   : > { %4378 = vpow2.f32 %v946_v37 }
 0x2fc   : > { %v954_v42 = vmul.f32 1.442695, %v939_v36 }
 0x2fd   : > { %v4237_v25 = vpop.permute.xlu0 %4236 }
 0x2fe   : > { %v4239_v26 = vunpack.i.h.bf16 %v4237_v25  ;;  %v4238_v27 = vunpack.i.l.bf16 %v4237_v25 }
 0x300   : > { %v4831_v28 = vpop.eup %4374  ;;  %v4016_v29 = vpack.c.bf16 %v4239_v26, %v4238_v27 }
 0x301   : > { %v962_v30 = vsel %vm907_vm3, %v4831_v28, 0.0 }
 0x302   : > { %963 = vadd.xlane.f32.xlu0 %v962_v30  ;;  %4017 = vmatprep.subr.bf16.mxu1 %v4016_v29 }
 0x303   : > { %4019 = vmatpush3.bf16.msra.mxu1 %v4016_v29 }
 0x304   : > { %v4835_v31 = vpop.eup %4376 }
 0x305   : > { %v971_v34 = vsel %vm907_vm3, %v4835_v31, 0.0  ;;  %v4843_v53 = vpop.eup %4378 }
 0x306   : > { %972 = vadd.xlane.f32.xlu0 %v971_v34 }
 0x30b   : > { %4251 = vrot.lane.b32.xlu1 %v4712_v38, %s4549_s28 }
 0x31d   : > { %v922_v40 = vpop.xlane.xlu1 %921 }
 0x31e   : > { %v936_v41 = vsub.f32 %v889_v50, %v922_v40  ;;  %v965_v50 = vsel %vm907_vm3, %v4843_v53, 0.0 }
 0x320   : > { %v948_v43 = vmul.f32 1.442695, %v936_v41 }
 0x321   : > { %v4242_v45 = vpop.permute.xlu1 %4241 }
 0x322   : > { %4380 = vpow2.f32 %v948_v43  ;;  %v4244_v47 = vunpack.i.h.bf16 %v4242_v45  ;;  %v4243_v49 = vunpack.i.l.bf16 %v4242_v45 }
 0x323   : > { %4382 = vpow2.f32 %v954_v42 }
 0x324   : > { %v4020_v51 = vpack.c.bf16 %v4244_v47, %v4243_v49 }
 0x326   : > { %4021 = vmatprep.subr.bf16.mxu1 %v4020_v51 }
 0x327   : > { %4023 = vmatpush3.bf16.msra.mxu1 %v4020_v51 }
 0x32c   : > { %v4845_v55 = vpop.eup %4380 }
 0x32d   : > { %v968_v32 = vsel %vm907_vm3, %v4845_v55, 0.0  ;;  %v4849_v46 = vpop.eup %4382 }
 0x32e   : > { %969 = vadd.xlane.f32.xlu0 %v968_v32  ;;  %v977_v56 = vsel %vm907_vm3, %v4849_v46, 0.0 }
 0x32f   : > { %966 = vadd.xlane.f32.xlu1 %v965_v50 }
 0x332   : > { %978 = vadd.xlane.f32.xlu0 %v977_v56 }
 0x340   : > { %4261 = vrot.lane.b32.xlu1 %v4726_v58, %s4549_s28 }
 0x344   : > { %4266 = vrot.lane.b32.xlu1 %v4731_v63, %s4549_s28 }
 0x348   : > { %1157 = vrot.lane.b32.xlu1 %v4714_v39, %s4550_s29 }
 0x34c   : > { %1159 = vrot.lane.b32.xlu1 %v4757_v17, %s4550_s29 }
 0x350   : > { %1163 = vrot.lane.b32.xlu1 %v4765_v19, %s4550_s29 }
 0x352   : > { %v928_v57 = vpop.xlane.xlu1 %927 }
 0x353   : > { %v938_v59 = vsub.f32 %v4818_v52, %v928_v57 }
 0x354   : > { %1167 = vrot.lane.b32.xlu1 %v4773_v21, %s4550_s29 }
 0x355   : > { %v952_v60 = vmul.f32 1.442695, %v938_v59 }
 0x356   : > { %v4247_v61 = vpop.permute.xlu1 %4246 }
 0x357   : > { %4384 = vpow2.f32 %v952_v60  ;;  %v4249_v0 = vunpack.i.h.bf16 %v4247_v61  ;;  %v4248_v1 = vunpack.i.l.bf16 %v4247_v61 }
 0x358   : > { %1171 = vrot.lane.b32.xlu1 %v4781_v23, %s4550_s29 }
 0x359   : > { %v4024_v2 = vpack.c.bf16 %v4249_v0, %v4248_v1 }
 0x35b   : > { %4025 = vmatprep.subr.bf16.mxu1 %v4024_v2 }
 0x35c   : > { %4027 = vmatpush3.bf16.msra.mxu1 %v4024_v2 }
 0x361   : > { %v4385_v4 = vpop.eup %4384 }
 0x362   : > { %v974_v5 = vsel %vm907_vm3, %v4385_v4, 0.0 }
 0x363   : > { %975 = vadd.xlane.f32.xlu0 %v974_v5 }
 0x379   : > { %4256 = vrot.lane.b32.xlu0 %v4721_v48, %s4549_s28 }
 0x37d   : > { %1161 = vrot.lane.b32.xlu0 %v4759_v18, %s4550_s29 }
 0x381   : > { %1165 = vrot.lane.b32.xlu0 %v4767_v20, %s4550_s29 }
 0x385   : > { %1169 = vrot.lane.b32.xlu0 %v4775_v22, %s4550_s29  ;;  %s5543_s29 = scalar_lea.vmem %s5582_s12, %s3446_s15 }
 0x386   : > { %v961_v52 = vpop.xlane.xlu0 %960 }
 0x387   : > { %4386 = vrcp.f32 %v961_v52  ;;  %v958_v6 = vpop.xlane.xlu1 %957 }
 0x388   : > { %4388 = vrcp.f32 %v958_v6 }
 0x38b   : > { %v4252_v7 = vpop.permute.xlu1 %4251 }
 0x38c   : > { %v4254_v8 = vunpack.i.h.bf16 %v4252_v7  ;;  %v4253_v9 = vunpack.i.l.bf16 %v4252_v7 }
 0x38e   : > { %v4028_v10 = vpack.c.bf16 %v4254_v8, %v4253_v9 }
 0x38f   : > { %v964_v13 = vpop.xlane.xlu0 %963 }
 0x390   : > { %4390 = vrcp.f32 %v964_v13  ;;  %4030 = vmatprep.subr.msk.bf16.mxu1 %vm4736_vm2, %v4028_v10 }
 0x391   : > { %v4387_v14 = vpop.eup %4386 }
 0x392   : > { %v4389_v15 = vpop.eup %4388  ;;  %v989_v25 = vmul.f32 %v4387_v14, %v4823_v11 }
 0x393   : > { %v988_v16 = vmul.f32 %v4389_v15, %v4825_v12  ;;  %v973_v29 = vpop.xlane.xlu0 %972 }
 0x395   : > { %3724 = vmatprep.mubr.msk.f32.mxu1 %vm907_vm3, %v988_v16 }
 0x396   : > { %3725 = vmatmul.mubr.msk.f32.vlgmr.msra.gmra.mrb[8].mxu1 %vm907_vm3, %v989_v25 }
 0x397   : > { %4033 = vmatpush3.bf16.xpose.msk.msra.mxu1 %vm4736_vm2, %v4028_v10 }
 0x39a   : > { %v4391_v26 = vpop.eup %4390 }
 0x39b   : > { %v990_v27 = vmul.f32 %v4391_v26, %v4831_v28 }
 0x39d   : > { %3727 = vmatprep.mubr.msk.f32.mxu1 %vm907_vm3, %v990_v27 }
 0x3bb   : > { %v970_v30 = vpop.xlane.xlu0 %969 }
 0x3bc   : > { %4392 = vrcp.f32 %v970_v30  ;;  %v967_v34 = vpop.xlane.xlu1 %966 }
 0x3bd   : > { %4394 = vrcp.f32 %v967_v34 }
 0x3be   : > { %4396 = vrcp.f32 %v973_v29 }
 0x3bf   : > { %v979_v40 = vpop.xlane.xlu0 %978 }
 0x3c0   : > { %4398 = vrcp.f32 %v979_v40  ;;  %v4262_v42 = vpop.permute.xlu1 %4261 }
 0x3c1   : > { %v4264_v45 = vunpack.i.h.bf16 %v4262_v42  ;;  %v4263_v47 = vunpack.i.l.bf16 %v4262_v42 }
 0x3c4   : > { %v4267_v32 = vpop.permute.xlu1 %4266 }
 0x3c5   : > { %v4269_v57 = vunpack.i.h.bf16 %v4267_v32  ;;  %v4268_v59 = vunpack.i.l.bf16 %v4267_v32 }
 0x3c6   : > { %v4393_v12 = vpop.eup %4392 }
 0x3c7   : > { %v4395_v11 = vpop.eup %4394  ;;  %v992_v37 = vmul.f32 %v4393_v12, %v4845_v55  ;;  %v4040_v55 = vpack.c.bf16 %v4264_v45, %v4263_v47  ;;  %v4046_v0 = vpack.c.bf16 %v4269_v57, %v4268_v59 }
 0x3c8   : > { %v991_v35 = vmul.f32 %v4395_v11, %v4843_v53  ;;  %v4397_v36 = vpop.eup %4396  ;;  %v1158_v61 = vpop.permute.xlu1 %1157 }
 0x3c9   : > { %v993_v28 = vmul.f32 %v4397_v36, %v4835_v31 }
 0x3ca   : > { %3728 = vmatmul.mubr.msk.f32.gmra.mrb[10].mxu1 %vm907_vm3, %v991_v35  ;;  %v4399_v50 = vpop.eup %4398 }
 0x3cb   : > { %3730 = vmatprep.mubr.msk.f32.mxu1 %vm907_vm3, %v992_v37  ;;  %v995_v60 = vmul.f32 %v4399_v50, %v4849_v46 }
 0x3cc   : > { %v1160_v1 = vpop.permute.xlu1 %1159 }
 0x3ce   : > { %3731 = vmatmul.mubr.msk.f32.gmra.mrb[12].mxu1 %vm907_vm3, %v993_v28 }
 0x3d0   : > { %v1164_v46 = vpop.permute.xlu1 %1163 }
 0x3d4   : > { %v1168_v5 = vpop.permute.xlu1 %1167 }
 0x3d8   : > { %v1172_v6 = vpop.permute.xlu1 %1171 }
 0x3f0   : > { %v976_v41 = vpop.xlane.xlu0 %975 }
 0x3f1   : > { %4400 = vrcp.f32 %v976_v41 }
 0x3f4   : > { %v4257_v43 = vpop.permute.xlu0 %4256 }
 0x3f5   : > { %v4259_v49 = vunpack.i.h.bf16 %v4257_v43  ;;  %v4258_v51 = vunpack.i.l.bf16 %v4257_v43 }
 0x3f7   : > { %v4034_v53 = vpack.c.bf16 %v4259_v49, %v4258_v51 }
 0x3f8   : > { %v1162_v2 = vpop.permute.xlu0 %1161 }
 0x3f9   : > { %4036 = vmatprep.subr.msk.bf16.mxu1 %vm4736_vm2, %v4034_v53 }
 0x3fa   : > { %4039 = vmatpush3.bf16.xpose.msk.msra.mxu1 %vm4736_vm2, %v4034_v53 }
 0x3fb   : > { %v4401_v31 = vpop.eup %4400  ;;  %4042 = vmatprep.subr.msk.bf16.mxu1 %vm4736_vm2, %v4040_v55 }
 0x3fc   : > { %v994_v56 = vmul.f32 %v4401_v31, %v4385_v4  ;;  %v1166_v4 = vpop.permute.xlu0 %1165 }
 0x3fe   : > { %3733 = vmatprep.mubr.msk.f32.mxu1 %vm907_vm3, %v994_v56 }
 0x3ff   : > { %3734 = vmatmul.mubr.msk.f32.gmra.mrb[14].mxu1 %vm907_vm3, %v995_v60 }
 0x400   : > { %3752 = vmatprep.mubr.msk.f32.mxu1 %vm761_vm1, %v1158_v61  ;;  %v1170_v52 = vpop.permute.xlu0 %1169 }
 0x402   : > { %4045 = vmatpush3.bf16.xpose.msk.msra.mxu1 %vm4736_vm2, %v4040_v55 }
 0x403   : > { %4048 = vmatprep.subr.msk.bf16.mxu1 %vm4736_vm2, %v4046_v0 }
 0x40a   : > { %4051 = vmatpush3.bf16.xpose.msk.msra.mxu1 %vm4736_vm2, %v4046_v0 }
 0x411   : > { %3753 = vmatmul.mubr.msk.f32.vlgmr.msra.gmra.mrb[16].mxu1 %vm761_vm1, %v1160_v1 }
 0x412   : > { %3755 = vmatprep.mubr.msk.f32.mxu1 %vm761_vm1, %v1162_v2 }
 0x415   : > { %3756 = vmatmul.mubr.msk.f32.gmra.mrb[18].mxu1 %vm761_vm1, %v1164_v46 }
 0x416   : > { %3758 = vmatprep.mubr.msk.f32.mxu1 %vm761_vm1, %v1166_v4 }
 0x419   : > { %3759 = vmatmul.mubr.msk.f32.gmra.mrb[20].mxu1 %vm761_vm1, %v1168_v5 }
 0x41a   : > { %3761 = vmatprep.mubr.msk.f32.mxu1 %vm761_vm1, %v1170_v52 }
 0x41d   : > { %3762 = vmatmul.mubr.msk.f32.gmra.mrb[22].mxu1 %vm761_vm1, %v1172_v6 }
 0x469   : > { %v4910_v7 = vpop.f32.mrb[8].mxu1 }
 0x46a   : > { %v4912_v8 = vpop.f32.mrb[9].mxu1 }
 0x49d   : > { %v4914_v9 = vpop.f32.mrb[10].mxu1 }
 0x49e   : > { %v4916_v10 = vpop.f32.mrb[11].mxu1 }
 0x4a1   : > { %v4918_v13 = vpop.f32.mrb[12].mxu1 }
 0x4a2   : > { %v4920_v14 = vpop.f32.mrb[13].mxu1 }
 0x4d2   : > { %v4922_v15 = vpop.f32.mrb[14].mxu1 }
 0x4d3   : > { %v4924_v16 = vpop.f32.mrb[15].mxu1 }
 0x4e4   : > { %v3754_v25 = vpop.f32.mrb[16].mxu1 }
 0x4e5   : > { %v1293_v26 = vadd.f32 %v3754_v25, %v4792_v24  ;;  %v1287_v27 = vpop.f32.mrb[17].mxu1 }
 0x4e6   : > { %v1288_v29 = vadd.f32 %v4792_v24, %v1287_v27 }
 0x4e7   : > { %v1329_v30 = vsel %vm907_vm3, %v1293_v26, -inf }
 0x4e8   : > { %1330 = vmax.xlane.f32.xlu1 %v1329_v30  ;;  %v3757_v34 = vpop.f32.mrb[18].mxu1  ;;  %v1326_v12 = vsel %vm907_vm3, %v1288_v29, -inf }
 0x4e9   : > { %v4931_v11 = vadd.f32 %v3757_v34, %v4792_v24  ;;  %v1297_v35 = vpop.f32.mrb[19].mxu1  ;;  %1327 = vmax.xlane.f32.xlu0 %v1326_v12 }
 0x4ea   : > { %v1298_v37 = vadd.f32 %v4792_v24, %v1297_v35 }
 0x4eb   : > { %v1335_v36 = vsel %vm907_vm3, %v4931_v11, -inf }
 0x4ec   : > { %v3760_v28 = vpop.f32.mrb[20].mxu1  ;;  %v1332_v43 = vsel %vm907_vm3, %v1298_v37, -inf }
 0x4ed   : > { %v1307_v40 = vpop.f32.mrb[21].mxu1  ;;  %1336 = vmax.xlane.f32.xlu0 %v1335_v36  ;;  %v1313_v41 = vadd.f32 %v3760_v28, %v4792_v24 }
 0x4ee   : > { %v1308_v53 = vadd.f32 %v4792_v24, %v1307_v40 }
 0x4ef   : > { %v1341_v49 = vsel %vm907_vm3, %v1313_v41, -inf }
 0x4f0   : > { %v3763_v42 = vpop.f32.mrb[22].mxu1  ;;  %v1338_v55 = vsel %vm907_vm3, %v1308_v53, -inf }
 0x4f1   : > { %v1317_v45 = vpop.f32.mrb[23].mxu1  ;;  %1333 = vmax.xlane.f32.xlu0 %v1332_v43  ;;  %v4939_v47 = vadd.f32 %v3763_v42, %v4792_v24 }
 0x4f2   : > { %v4950_v32 = vadd.f32 %v4792_v24, %v1317_v45 }
 0x4f3   : > { %v1347_v51 = vsel %vm907_vm3, %v4939_v47, -inf }
 0x4f4   : > { %v1344_v50 = vsel %vm907_vm3, %v4950_v32, -inf }
 0x4f5   : > { %1342 = vmax.xlane.f32.xlu0 %v1341_v49 }
 0x4f9   : > { %4271 = vrot.lane.b32.xlu1 %v4709_v33, %s4551_s30  ;;  %1348 = vmax.xlane.f32.xlu0 %v1347_v51 }
 0x50f   : > { %4276 = vrot.lane.b32.xlu0 %v4719_v44, %s4551_s30 }
 0x51d   : > { %1339 = vmax.xlane.f32.xlu1 %v1338_v55 }
 0x52e   : > { %4281 = vrot.lane.b32.xlu1 %v4724_v54, %s4551_s30 }
 0x552   : > { %1345 = vmax.xlane.f32.xlu1 %v1344_v50 }
 0x563   : > { %4286 = vrot.lane.b32.xlu1 %v4729_v62, %s4551_s30 }
 0x575   : > { %v1331_v31 = vpop.xlane.xlu1 %1330 }
 0x576   : > { %v1351_v56 = vsub.f32 %v1293_v26, %v1331_v31  ;;  %v1328_v57 = vpop.xlane.xlu0 %1327 }
 0x577   : > { %v1350_v59 = vsub.f32 %v1288_v29, %v1328_v57 }
 0x578   : > { %v1360_v60 = vmul.f32 1.442695, %v1351_v56 }
 0x579   : > { %v1358_v61 = vmul.f32 1.442695, %v1350_v59  ;;  %v4272_v0 = vpop.permute.xlu1 %4271 }
 0x57a   : > { %4402 = vpow2.f32 %v1360_v60  ;;  %v4274_v1 = vunpack.i.h.bf16 %v4272_v0  ;;  %v4273_v2 = vunpack.i.l.bf16 %v4272_v0  ;;  %v1337_v46 = vpop.xlane.xlu0 %1336 }
 0x57b   : > { %4404 = vpow2.f32 %v1358_v61  ;;  %v1353_v49 = vsub.f32 %v4931_v11, %v1337_v46 }
 0x57c   : > { %v4052_v4 = vpack.c.bf16 %v4274_v1, %v4273_v2 }
 0x57d   : > { %v1364_v55 = vmul.f32 1.442695, %v1353_v49 }
 0x57e   : > { %4053 = vmatprep.subr.bf16.mxu0 %v4052_v4  ;;  %v1334_v5 = vpop.xlane.xlu0 %1333 }
 0x57f   : > { %v1352_v52 = vsub.f32 %v1298_v37, %v1334_v5  ;;  %4055 = vmatpush3.bf16.msra.mxu0 %v4052_v4 }
 0x581   : > { %v1362_v6 = vmul.f32 1.442695, %v1352_v52 }
 0x582   : > { %v1343_v25 = vpop.xlane.xlu0 %1342 }
 0x583   : > { %4406 = vpow2.f32 %v1362_v6  ;;  %v1355_v27 = vsub.f32 %v1313_v41, %v1343_v25 }
 0x584   : > { %v4955_v26 = vpop.eup %4402 }
 0x585   : > { %v4957_v29 = vpop.eup %4404  ;;  %v1368_v30 = vmul.f32 1.442695, %v1355_v27  ;;  %v1377_v34 = vsel %vm907_vm3, %v4955_v26, 0.0 }
 0x586   : > { %1378 = vadd.xlane.f32.xlu0 %v1377_v34  ;;  %v1349_v12 = vpop.xlane.xlu0 %1348  ;;  %v1374_v35 = vsel %vm907_vm3, %v4957_v29, 0.0 }
 0x587   : > { %4408 = vpow2.f32 %v1368_v30  ;;  %1375 = vadd.xlane.f32.xlu1 %v1374_v35  ;;  %v1357_v51 = vsub.f32 %v4939_v47, %v1349_v12 }
 0x588   : > { %4410 = vpow2.f32 %v1364_v55 }
 0x589   : > { %v1372_v56 = vmul.f32 1.442695, %v1357_v51 }
 0x58a   : > { %v4277_v36 = vpop.permute.xlu0 %4276 }
 0x58b   : > { %v4279_v37 = vunpack.i.h.bf16 %v4277_v36  ;;  %v4278_v28 = vunpack.i.l.bf16 %v4277_v36 }
 0x58d   : > { %v4963_v40 = vpop.eup %4406  ;;  %v4056_v41 = vpack.c.bf16 %v4279_v37, %v4278_v28 }
 0x58e   : > { %v1380_v42 = vsel %vm907_vm3, %v4963_v40, 0.0 }
 0x58f   : > { %1381 = vadd.xlane.f32.xlu0 %v1380_v42  ;;  %4057 = vmatprep.subr.bf16.mxu0 %v4056_v41 }
 0x590   : > { %4059 = vmatpush3.bf16.msra.mxu0 %v4056_v41 }
 0x591   : > { %v4967_v43 = vpop.eup %4408 }
 0x592   : > { %v1389_v45 = vsel %vm907_vm3, %v4967_v43, 0.0  ;;  %v4975_v1 = vpop.eup %4410 }
 0x593   : > { %1390 = vadd.xlane.f32.xlu0 %v1389_v45 }
 0x598   : > { %4291 = vrot.lane.b32.xlu1 %v4712_v38, %s4552_s13 }
 0x5aa   : > { %v1340_v50 = vpop.xlane.xlu1 %1339 }
 0x5ab   : > { %v1354_v31 = vsub.f32 %v1308_v53, %v1340_v50  ;;  %v1383_v53 = vsel %vm907_vm3, %v4975_v1, 0.0 }
 0x5ad   : > { %v1366_v57 = vmul.f32 1.442695, %v1354_v31 }
 0x5ae   : > { %v4282_v59 = vpop.permute.xlu1 %4281 }
 0x5af   : > { %4412 = vpow2.f32 %v1366_v57  ;;  %v4284_v60 = vunpack.i.h.bf16 %v4282_v59  ;;  %v4283_v61 = vunpack.i.l.bf16 %v4282_v59 }
 0x5b0   : > { %4414 = vpow2.f32 %v1372_v56 }
 0x5b1   : > { %v4060_v0 = vpack.c.bf16 %v4284_v60, %v4283_v61 }
 0x5b3   : > { %4061 = vmatprep.subr.bf16.mxu0 %v4060_v0 }
 0x5b4   : > { %4063 = vmatpush3.bf16.msra.mxu0 %v4060_v0 }
 0x5b9   : > { %v4977_v2 = vpop.eup %4412 }
 0x5ba   : > { %v1386_v11 = vsel %vm907_vm3, %v4977_v2, 0.0  ;;  %v4981_v47 = vpop.eup %4414 }
 0x5bb   : > { %1387 = vadd.xlane.f32.xlu0 %v1386_v11  ;;  %v1395_v46 = vsel %vm907_vm3, %v4981_v47, 0.0 }
 0x5bc   : > { %1384 = vadd.xlane.f32.xlu1 %v1383_v53 }
 0x5bf   : > { %1396 = vadd.xlane.f32.xlu0 %v1395_v46 }
 0x5cd   : > { %4301 = vrot.lane.b32.xlu1 %v4726_v58, %s4552_s13 }
 0x5d1   : > { %4306 = vrot.lane.b32.xlu1 %v4731_v63, %s4552_s13 }
 0x5d5   : > { %1567 = vrot.lane.b32.xlu1 %v4714_v39, %s4553_s14 }
 0x5d9   : > { %1569 = vrot.lane.b32.xlu1 %v4757_v17, %s4553_s14 }
 0x5dd   : > { %1573 = vrot.lane.b32.xlu1 %v4765_v19, %s4553_s14 }
 0x5df   : > { %v1346_v4 = vpop.xlane.xlu1 %1345 }
 0x5e0   : > { %v1356_v5 = vsub.f32 %v4950_v32, %v1346_v4 }
 0x5e1   : > { %1577 = vrot.lane.b32.xlu1 %v4773_v21, %s4553_s14 }
 0x5e2   : > { %v1370_v52 = vmul.f32 1.442695, %v1356_v5 }
 0x5e3   : > { %v4287_v6 = vpop.permute.xlu1 %4286 }
 0x5e4   : > { %4416 = vpow2.f32 %v1370_v52  ;;  %v4289_v25 = vunpack.i.h.bf16 %v4287_v6  ;;  %v4288_v27 = vunpack.i.l.bf16 %v4287_v6 }
 0x5e5   : > { %1581 = vrot.lane.b32.xlu1 %v4781_v23, %s4553_s14 }
 0x5e6   : > { %v4064_v30 = vpack.c.bf16 %v4289_v25, %v4288_v27 }
 0x5e8   : > { %4065 = vmatprep.subr.bf16.mxu0 %v4064_v30 }
 0x5e9   : > { %4067 = vmatpush3.bf16.msra.mxu0 %v4064_v30 }
 0x5ee   : > { %v4417_v34 = vpop.eup %4416 }
 0x5ef   : > { %v1392_v12 = vsel %vm907_vm3, %v4417_v34, 0.0 }
 0x5f0   : > { %1393 = vadd.xlane.f32.xlu0 %v1392_v12 }
 0x606   : > { %4296 = vrot.lane.b32.xlu0 %v4721_v48, %s4552_s13 }
 0x60a   : > { %1571 = vrot.lane.b32.xlu0 %v4759_v18, %s4553_s14 }
 0x60e   : > { %1575 = vrot.lane.b32.xlu0 %v4767_v20, %s4553_s14 }
 0x612   : > { %1579 = vrot.lane.b32.xlu0 %v4775_v22, %s4553_s14 }
 0x613   : > { %v1379_v32 = vpop.xlane.xlu0 %1378 }
 0x614   : > { %4418 = vrcp.f32 %v1379_v32  ;;  %v1376_v35 = vpop.xlane.xlu1 %1375 }
 0x615   : > { %4420 = vrcp.f32 %v1376_v35 }
 0x618   : > { %v4292_v36 = vpop.permute.xlu1 %4291 }
 0x619   : > { %v4294_v37 = vunpack.i.h.bf16 %v4292_v36  ;;  %v4293_v28 = vunpack.i.l.bf16 %v4292_v36 }
 0x61b   : > { %v4068_v41 = vpack.c.bf16 %v4294_v37, %v4293_v28 }
 0x61c   : > { %v1382_v42 = vpop.xlane.xlu0 %1381 }
 0x61d   : > { %4422 = vrcp.f32 %v1382_v42  ;;  %4070 = vmatprep.subr.msk.bf16.mxu0 %vm4736_vm2, %v4068_v41 }
 0x61e   : > { %v4419_v45 = vpop.eup %4418 }
 0x61f   : > { %v4421_v49 = vpop.eup %4420  ;;  %v1407_v55 = vmul.f32 %v4419_v45, %v4955_v26 }
 0x620   : > { %v1406_v51 = vmul.f32 %v4421_v49, %v4957_v29  ;;  %v1391_v56 = vpop.xlane.xlu0 %1390 }
 0x622   : > { %3780 = vmatprep.mubr.msk.f32.mxu0 %vm907_vm3, %v1406_v51 }
 0x623   : > { %3781 = vmatmul.mubr.msk.f32.vlgmr.msra.gmra.mrb[16].mxu0 %vm907_vm3, %v1407_v55 }
 0x624   : > { %4073 = vmatpush3.bf16.xpose.msk.msra.mxu0 %vm4736_vm2, %v4068_v41 }
 0x627   : > { %v4423_v50 = vpop.eup %4422 }
 0x628   : > { %v1408_v31 = vmul.f32 %v4423_v50, %v4963_v40 }
 0x62a   : > { %3783 = vmatprep.mubr.msk.f32.mxu0 %vm907_vm3, %v1408_v31 }
 0x648   : > { %v1388_v57 = vpop.xlane.xlu0 %1387 }
 0x649   : > { %4424 = vrcp.f32 %v1388_v57  ;;  %v1385_v59 = vpop.xlane.xlu1 %1384 }
 0x64a   : > { %4426 = vrcp.f32 %v1385_v59 }
 0x64b   : > { %4428 = vrcp.f32 %v1391_v56 }
 0x64c   : > { %v1397_v11 = vpop.xlane.xlu0 %1396 }
 0x64d   : > { %4430 = vrcp.f32 %v1397_v11  ;;  %v4302_v46 = vpop.permute.xlu1 %4301 }
 0x64e   : > { %v4304_v5 = vunpack.i.h.bf16 %v4302_v46  ;;  %v4303_v52 = vunpack.i.l.bf16 %v4302_v46 }
 0x651   : > { %v4307_v27 = vpop.permute.xlu1 %4306 }
 0x652   : > { %v4309_v32 = vunpack.i.h.bf16 %v4307_v27  ;;  %v4308_v35 = vunpack.i.l.bf16 %v4307_v27 }
 0x653   : > { %v4425_v29 = vpop.eup %4424 }
 0x654   : > { %v4427_v26 = vpop.eup %4426  ;;  %v1410_v0 = vmul.f32 %v4425_v29, %v4977_v2  ;;  %v4080_v2 = vpack.c.bf16 %v4304_v5, %v4303_v52  ;;  %v4086_v28 = vpack.c.bf16 %v4309_v32, %v4308_v35 }
 0x655   : > { %v1409_v60 = vmul.f32 %v4427_v26, %v4975_v1  ;;  %v4429_v61 = vpop.eup %4428  ;;  %v1568_v37 = vpop.permute.xlu1 %1567 }
 0x656   : > { %v1411_v40 = vmul.f32 %v4429_v61, %v4967_v43 }
 0x657   : > { %3784 = vmatmul.mubr.msk.f32.gmra.mrb[18].mxu0 %vm907_vm3, %v1409_v60  ;;  %v4431_v30 = vpop.eup %4430 }
 0x658   : > { %3786 = vmatprep.mubr.msk.f32.mxu0 %vm907_vm3, %v1410_v0  ;;  %v1413_v36 = vmul.f32 %v4431_v30, %v4981_v47 }
 0x659   : > { %v1570_v41 = vpop.permute.xlu1 %1569 }
 0x65b   : > { %3787 = vmatmul.mubr.msk.f32.gmra.mrb[20].mxu0 %vm907_vm3, %v1411_v40 }
 0x65d   : > { %v1574_v47 = vpop.permute.xlu1 %1573 }
 0x661   : > { %v1578_v45 = vpop.permute.xlu1 %1577 }
 0x665   : > { %v1582_v51 = vpop.permute.xlu1 %1581 }
 0x67d   : > { %v1394_v53 = vpop.xlane.xlu0 %1393 }
 0x67e   : > { %4432 = vrcp.f32 %v1394_v53 }
 0x681   : > { %v4297_v4 = vpop.permute.xlu0 %4296 }
 0x682   : > { %v4299_v1 = vunpack.i.h.bf16 %v4297_v4  ;;  %v4298_v6 = vunpack.i.l.bf16 %v4297_v4 }
 0x684   : > { %v4074_v25 = vpack.c.bf16 %v4299_v1, %v4298_v6 }
 0x686   : > { %4076 = vmatprep.subr.msk.bf16.mxu0 %vm4736_vm2, %v4074_v25 }
 0x687   : > { %4079 = vmatpush3.bf16.xpose.msk.msra.mxu0 %vm4736_vm2, %v4074_v25 }
 0x688   : > { %v4433_v43 = vpop.eup %4432  ;;  %4082 = vmatprep.subr.msk.bf16.mxu0 %vm4736_vm2, %v4080_v2 }
 0x689   : > { %v1412_v12 = vmul.f32 %v4433_v43, %v4417_v34  ;;  %v1572_v34 = vpop.permute.xlu0 %1571 }
 0x68b   : > { %3789 = vmatprep.mubr.msk.f32.mxu0 %vm907_vm3, %v1412_v12 }
 0x68c   : > { %3790 = vmatmul.mubr.msk.f32.gmra.mrb[22].mxu0 %vm907_vm3, %v1413_v36 }
 0x68d   : > { %3808 = vmatprep.mubr.msk.f32.mxu0 %vm761_vm1, %v1568_v37  ;;  %v1576_v42 = vpop.permute.xlu0 %1575 }
 0x68f   : > { %4085 = vmatpush3.bf16.xpose.msk.msra.mxu0 %vm4736_vm2, %v4080_v2 }
 0x690   : > { %4088 = vmatprep.subr.msk.bf16.mxu0 %vm4736_vm2, %v4086_v28 }
 0x691   : > { %v1580_v49 = vpop.permute.xlu0 %1579 }
 0x697   : > { %4091 = vmatpush3.bf16.xpose.msk.msra.mxu0 %vm4736_vm2, %v4086_v28 }
 0x69e   : > { %3809 = vmatmul.mubr.msk.f32.vlgmr.msra.gmra.mrb[24].mxu0 %vm761_vm1, %v1570_v41 }
 0x69f   : > { %3811 = vmatprep.mubr.msk.f32.mxu0 %vm761_vm1, %v1572_v34 }
 0x6a2   : > { %3812 = vmatmul.mubr.msk.f32.gmra.mrb[26].mxu0 %vm761_vm1, %v1574_v47 }
 0x6a3   : > { %3814 = vmatprep.mubr.msk.f32.mxu0 %vm761_vm1, %v1576_v42 }
 0x6a6   : > { %3815 = vmatmul.mubr.msk.f32.gmra.mrb[28].mxu0 %vm761_vm1, %v1578_v45 }
 0x6a7   : > { %3817 = vmatprep.mubr.msk.f32.mxu0 %vm761_vm1, %v1580_v49 }
 0x6aa   : > { %3818 = vmatmul.mubr.msk.f32.gmra.mrb[30].mxu0 %vm761_vm1, %v1582_v51 }
 0x6f6   : > { %v5042_v55 = vpop.f32.mrb[16].mxu0 }
 0x6f7   : > { %v5044_v50 = vpop.f32.mrb[17].mxu0 }
 0x72a   : > { %v5046_v31 = vpop.f32.mrb[18].mxu0 }
 0x72b   : > { %v5048_v56 = vpop.f32.mrb[19].mxu0 }
 0x72e   : > { %v5050_v57 = vpop.f32.mrb[20].mxu0 }
 0x72f   : > { %v5052_v59 = vpop.f32.mrb[21].mxu0 }
 0x75f   : > { %v5054_v29 = vpop.f32.mrb[22].mxu0 }
 0x760   : > { %v5056_v26 = vpop.f32.mrb[23].mxu0 }
 0x771   : > { %v3810_v60 = vpop.f32.mrb[24].mxu0 }
 0x772   : > { %v1703_v61 = vadd.f32 %v3810_v60, %v4792_v24  ;;  %v1697_v0 = vpop.f32.mrb[25].mxu0 }
 0x773   : > { %v1698_v40 = vadd.f32 %v4792_v24, %v1697_v0 }
 0x774   : > { %v1739_v11 = vsel %vm907_vm3, %v1703_v61, -inf }
 0x775   : > { %1740 = vmax.xlane.f32.xlu1 %v1739_v11  ;;  %v3813_v53 = vpop.f32.mrb[26].mxu0  ;;  %v1736_v46 = vsel %vm907_vm3, %v1698_v40, -inf }
 0x776   : > { %v5063_v4 = vadd.f32 %v3813_v53, %v4792_v24  ;;  %v1707_v5 = vpop.f32.mrb[27].mxu0  ;;  %1737 = vmax.xlane.f32.xlu0 %v1736_v46 }
 0x777   : > { %v1708_v1 = vadd.f32 %v4792_v24, %v1707_v5 }
 0x778   : > { %v1745_v52 = vsel %vm907_vm3, %v5063_v4, -inf }
 0x779   : > { %v3816_v6 = vpop.f32.mrb[28].mxu0  ;;  %v1742_v30 = vsel %vm907_vm3, %v1708_v1, -inf }
 0x77a   : > { %v1717_v25 = vpop.f32.mrb[29].mxu0  ;;  %1746 = vmax.xlane.f32.xlu0 %v1745_v52  ;;  %v1723_v2 = vadd.f32 %v3816_v6, %v4792_v24 }
 0x77b   : > { %v1718_v36 = vadd.f32 %v4792_v24, %v1717_v25 }
 0x77c   : > { %v1751_v32 = vsel %vm907_vm3, %v1723_v2, -inf }
 0x77d   : > { %v3819_v27 = vpop.f32.mrb[30].mxu0  ;;  %v1748_v37 = vsel %vm907_vm3, %v1718_v36, -inf }
 0x77e   : > { %v1727_v43 = vpop.f32.mrb[31].mxu0  ;;  %1743 = vmax.xlane.f32.xlu0 %v1742_v30  ;;  %v5071_v12 = vadd.f32 %v3819_v27, %v4792_v24 }
 0x77f   : > { %v5082_v28 = vadd.f32 %v4792_v24, %v1727_v43 }
 0x780   : > { %v1757_v35 = vsel %vm907_vm3, %v5071_v12, -inf }
 0x781   : > { %v1754_v41 = vsel %vm907_vm3, %v5082_v28, -inf }
 0x782   : > { %1752 = vmax.xlane.f32.xlu0 %v1751_v32 }
 0x786   : > { %4311 = vrot.lane.b32.xlu1 %v4709_v33, %s4554_s16  ;;  %1758 = vmax.xlane.f32.xlu0 %v1757_v35 }
 0x79c   : > { %4316 = vrot.lane.b32.xlu0 %v4719_v44, %s4554_s16 }
 0x7aa   : > { %1749 = vmax.xlane.f32.xlu1 %v1748_v37 }
 0x7bb   : > { %4321 = vrot.lane.b32.xlu1 %v4724_v54, %s4554_s16 }
 0x7df   : > { %1755 = vmax.xlane.f32.xlu1 %v1754_v41 }
 0x7f0   : > { %4326 = vrot.lane.b32.xlu1 %v4729_v62, %s4554_s16  ;;  %s4560_s16 = smov 24  }
 0x802   : > { %v1741_v34 = vpop.xlane.xlu1 %1740 }
 0x803   : > { %v1761_v47 = vsub.f32 %v1703_v61, %v1741_v34  ;;  %v1738_v42 = vpop.xlane.xlu0 %1737 }
 0x804   : > { %v1760_v45 = vsub.f32 %v1698_v40, %v1738_v42 }
 0x805   : > { %v1770_v49 = vmul.f32 1.442695, %v1761_v47 }
 0x806   : > { %v1768_v51 = vmul.f32 1.442695, %v1760_v45  ;;  %v4312_v60 = vpop.permute.xlu1 %4311 }
 0x807   : > { %4434 = vpow2.f32 %v1770_v49  ;;  %v4314_v0 = vunpack.i.h.bf16 %v4312_v60  ;;  %v4313_v11 = vunpack.i.l.bf16 %v4312_v60  ;;  %v1747_v53 = vpop.xlane.xlu0 %1746 }
 0x808   : > { %4436 = vpow2.f32 %v1768_v51  ;;  %v1763_v45 = vsub.f32 %v5063_v4, %v1747_v53 }
 0x809   : > { %v4092_v24 = vpack.c.bf16 %v4314_v0, %v4313_v11 }
 0x80a   : > { %v1774_v51 = vmul.f32 1.442695, %v1763_v45 }
 0x80b   : > { %4093 = vmatprep.subr.bf16.mxu1 %v4092_v24  ;;  %v1744_v46 = vpop.xlane.xlu0 %1743 }
 0x80c   : > { %v1762_v5 = vsub.f32 %v1708_v1, %v1744_v46  ;;  %4095 = vmatpush3.bf16.msra.mxu1 %v4092_v24 }
 0x80e   : > { %v1772_v52 = vmul.f32 1.442695, %v1762_v5 }
 0x80f   : > { %v1753_v6 = vpop.xlane.xlu0 %1752 }
 0x810   : > { %4438 = vpow2.f32 %v1772_v52  ;;  %v1765_v25 = vsub.f32 %v1723_v2, %v1753_v6 }
 0x811   : > { %v5087_v61 = vpop.eup %4434 }
 0x812   : > { %v5089_v40 = vpop.eup %4436  ;;  %v1778_v27 = vmul.f32 1.442695, %v1765_v25  ;;  %v1787_v30 = vsel %vm907_vm3, %v5087_v61, 0.0 }
 0x813   : > { %1788 = vadd.xlane.f32.xlu0 %v1787_v30  ;;  %v1759_v43 = vpop.xlane.xlu0 %1758  ;;  %v1784_v32 = vsel %vm907_vm3, %v5089_v40, 0.0 }
 0x814   : > { %4440 = vpow2.f32 %v1778_v27  ;;  %1785 = vadd.xlane.f32.xlu1 %v1784_v32  ;;  %v1767_v49 = vsub.f32 %v5071_v12, %v1759_v43 }
 0x815   : > { %4442 = vpow2.f32 %v1774_v51 }
 0x816   : > { %v1782_v11 = vmul.f32 1.442695, %v1767_v49 }
 0x817   : > { %v4317_v1 = vpop.permute.xlu0 %4316 }
 0x818   : > { %v4319_v35 = vunpack.i.h.bf16 %v4317_v1  ;;  %v4318_v37 = vunpack.i.l.bf16 %v4317_v1 }
 0x81a   : > { %v5095_v41 = vpop.eup %4438  ;;  %v4096_v2 = vpack.c.bf16 %v4319_v35, %v4318_v37 }
 0x81b   : > { %v1790_v34 = vsel %vm907_vm3, %v5095_v41, 0.0 }
 0x81c   : > { %1791 = vadd.xlane.f32.xlu0 %v1790_v34  ;;  %4097 = vmatprep.subr.bf16.mxu1 %v4096_v2 }
 0x81d   : > { %4099 = vmatpush3.bf16.msra.mxu1 %v4096_v2 }
 0x81e   : > { %v5099_v47 = vpop.eup %4440 }
 0x81f   : > { %v1799_v42 = vsel %vm907_vm3, %v5099_v47, 0.0  ;;  %v5107_v25 = vpop.eup %4442 }
 0x820   : > { %1800 = vadd.xlane.f32.xlu0 %v1799_v42 }
 0x825   : > { %4331 = vrot.lane.b32.xlu1 %v4712_v38, %s4555_s17 }
 0x837   : > { %v1750_v60 = vpop.xlane.xlu1 %1749 }
 0x838   : > { %v1764_v0 = vsub.f32 %v1718_v36, %v1750_v60  ;;  %v1793_v36 = vsel %vm907_vm3, %v5107_v25, 0.0 }
 0x83a   : > { %v1776_v24 = vmul.f32 1.442695, %v1764_v0 }
 0x83b   : > { %v4322_v46 = vpop.permute.xlu1 %4321 }
 0x83c   : > { %4444 = vpow2.f32 %v1776_v24  ;;  %v4324_v5 = vunpack.i.h.bf16 %v4322_v46  ;;  %v4323_v52 = vunpack.i.l.bf16 %v4322_v46 }
 0x83d   : > { %4446 = vpow2.f32 %v1782_v11 }
 0x83e   : > { %v4100_v6 = vpack.c.bf16 %v4324_v5, %v4323_v52 }
 0x840   : > { %4101 = vmatprep.subr.bf16.mxu1 %v4100_v6 }
 0x841   : > { %4103 = vmatpush3.bf16.msra.mxu1 %v4100_v6 }
 0x846   : > { %v5109_v38 = vpop.eup %4444 }
 0x847   : > { %v1796_v4 = vsel %vm907_vm3, %v5109_v38, 0.0  ;;  %v5113_v12 = vpop.eup %4446 }
 0x848   : > { %1797 = vadd.xlane.f32.xlu0 %v1796_v4  ;;  %v1805_v53 = vsel %vm907_vm3, %v5113_v12, 0.0 }
 0x849   : > { %1794 = vadd.xlane.f32.xlu1 %v1793_v36 }
 0x84c   : > { %1806 = vadd.xlane.f32.xlu0 %v1805_v53 }
 0x85a   : > { %4341 = vrot.lane.b32.xlu1 %v4726_v58, %s4555_s17 }
 0x85e   : > { %4346 = vrot.lane.b32.xlu1 %v4731_v63, %s4555_s17 }
 0x862   : > { %1977 = vrot.lane.b32.xlu1 %v4714_v39, %s4556_s19 }
 0x866   : > { %1979 = vrot.lane.b32.xlu1 %v4757_v17, %s4556_s19 }
 0x86a   : > { %1983 = vrot.lane.b32.xlu1 %v4765_v19, %s4556_s19 }
 0x86c   : > { %v1756_v27 = vpop.xlane.xlu1 %1755 }
 0x86d   : > { %v1766_v30 = vsub.f32 %v5082_v28, %v1756_v27 }
 0x86e   : > { %1987 = vrot.lane.b32.xlu1 %v4773_v21, %s4556_s19 }
 0x86f   : > { %v1780_v43 = vmul.f32 1.442695, %v1766_v30 }
 0x870   : > { %v4327_v32 = vpop.permute.xlu1 %4326 }
 0x871   : > { %4448 = vpow2.f32 %v1780_v43  ;;  %v4329_v1 = vunpack.i.h.bf16 %v4327_v32  ;;  %v4328_v58 = vunpack.i.l.bf16 %v4327_v32 }
 0x872   : > { %1991 = vrot.lane.b32.xlu1 %v4781_v23, %s4556_s19 }
 0x873   : > { %v4104_v63 = vpack.c.bf16 %v4329_v1, %v4328_v58 }
 0x875   : > { %4105 = vmatprep.subr.bf16.mxu1 %v4104_v63 }
 0x876   : > { %4107 = vmatpush3.bf16.msra.mxu1 %v4104_v63 }
 0x87b   : > { %v4449_v39 = vpop.eup %4448 }
 0x87c   : > { %v1802_v17 = vsel %vm907_vm3, %v4449_v39, 0.0 }
 0x87d   : > { %1803 = vadd.xlane.f32.xlu0 %v1802_v17 }
 0x893   : > { %4336 = vrot.lane.b32.xlu0 %v4721_v48, %s4555_s17 }
 0x897   : > { %1981 = vrot.lane.b32.xlu0 %v4759_v18, %s4556_s19 }
 0x89b   : > { %1985 = vrot.lane.b32.xlu0 %v4767_v20, %s4556_s19 }
 0x89f   : > { %1989 = vrot.lane.b32.xlu0 %v4775_v22, %s4556_s19 }
 0x8a0   : > { %v1789_v19 = vpop.xlane.xlu0 %1788 }
 0x8a1   : > { %4450 = vrcp.f32 %v1789_v19  ;;  %v1786_v21 = vpop.xlane.xlu1 %1785 }
 0x8a2   : > { %4452 = vrcp.f32 %v1786_v21 }
 0x8a5   : > { %v4332_v23 = vpop.permute.xlu1 %4331 }
 0x8a6   : > { %v4334_v28 = vunpack.i.h.bf16 %v4332_v23  ;;  %v4333_v35 = vunpack.i.l.bf16 %v4332_v23 }
 0x8a8   : > { %v4108_v37 = vpack.c.bf16 %v4334_v28, %v4333_v35 }
 0x8a9   : > { %v1792_v2 = vpop.xlane.xlu0 %1791 }
 0x8aa   : > { %4454 = vrcp.f32 %v1792_v2  ;;  %4110 = vmatprep.subr.msk.bf16.mxu1 %vm4736_vm2, %v4108_v37 }
 0x8ab   : > { %v4451_v48 = vpop.eup %4450 }
 0x8ac   : > { %v4453_v34 = vpop.eup %4452  ;;  %v1817_v20 = vmul.f32 %v4451_v48, %v5087_v61 }
 0x8ad   : > { %v1816_v18 = vmul.f32 %v4453_v34, %v5089_v40  ;;  %v1801_v45 = vpop.xlane.xlu0 %1800 }
 0x8af   : > { %3836 = vmatprep.mubr.msk.f32.mxu1 %vm907_vm3, %v1816_v18 }
 0x8b0   : > { %3837 = vmatmul.mubr.msk.f32.vlgmr.msra.gmra.mrb[24].mxu1 %vm907_vm3, %v1817_v20 }
 0x8b1   : > { %4113 = vmatpush3.bf16.xpose.msk.msra.mxu1 %vm4736_vm2, %v4108_v37 }
 0x8b4   : > { %v4455_v22 = vpop.eup %4454 }
 0x8b5   : > { %v1818_v42 = vmul.f32 %v4455_v22, %v5095_v41 }
 0x8b7   : > { %3839 = vmatprep.mubr.msk.f32.mxu1 %vm907_vm3, %v1818_v42 }
 0x8d5   : > { %v1798_v49 = vpop.xlane.xlu0 %1797 }
 0x8d6   : > { %4456 = vrcp.f32 %v1798_v49  ;;  %v1795_v51 = vpop.xlane.xlu1 %1794 }
 0x8d7   : > { %4458 = vrcp.f32 %v1795_v51 }
 0x8d8   : > { %4460 = vrcp.f32 %v1801_v45  ;;  %v4530_v45 = vld [vmem:[%s4789_s26] ss:$0 sm:$0xff] }
 0x8d9   : > { %v1807_v24 = vpop.xlane.xlu0 %1806 }
 0x8da   : > { %4462 = vrcp.f32 %v1807_v24  ;;  %v4342_v5 = vpop.permute.xlu1 %4341 }
 0x8db   : > { %v4344_v6 = vunpack.i.h.bf16 %v4342_v5  ;;  %v4343_v4 = vunpack.i.l.bf16 %v4342_v5 }
 0x8de   : > { %v4347_v27 = vpop.permute.xlu1 %4346 }
 0x8df   : > { %v4349_v32 = vunpack.i.h.bf16 %v4347_v27  ;;  %v4348_v1 = vunpack.i.l.bf16 %v4347_v27 }
 0x8e0   : > { %v4457_v40 = vpop.eup %4456 }
 0x8e1   : > { %v4459_v61 = vpop.eup %4458  ;;  %v1820_v11 = vmul.f32 %v4457_v40, %v5109_v38  ;;  %v4120_v38 = vpack.c.bf16 %v4344_v6, %v4343_v4  ;;  %v4126_v17 = vpack.c.bf16 %v4349_v32, %v4348_v1 }
 0x8e2   : > { %v1819_v60 = vmul.f32 %v4459_v61, %v5107_v25  ;;  %v4461_v0 = vpop.eup %4460  ;;  %v1978_v63 = vpop.permute.xlu1 %1977 }
 0x8e3   : > { %v1821_v41 = vmul.f32 %v4461_v0, %v5099_v47 }
 0x8e4   : > { %3840 = vmatmul.mubr.msk.f32.gmra.mrb[26].mxu1 %vm907_vm3, %v1819_v60  ;;  %v4463_v30 = vpop.eup %4462 }
 0x8e5   : > { %3842 = vmatprep.mubr.msk.f32.mxu1 %vm907_vm3, %v1820_v11  ;;  %v1823_v58 = vmul.f32 %v4463_v30, %v5113_v12 }
 0x8e6   : > { %v1980_v19 = vpop.permute.xlu1 %1979 }
 0x8e8   : > { %3843 = vmatmul.mubr.msk.f32.gmra.mrb[28].mxu1 %vm907_vm3, %v1821_v41 }
 0x8ea   : > { %v1984_v12 = vpop.permute.xlu1 %1983 }
 0x8ee   : > { %v1988_v23 = vpop.permute.xlu1 %1987 }
 0x8f2   : > { %v1992_v3 = vpop.permute.xlu1 %1991 }
 0x90a   : > { %v1804_v46 = vpop.xlane.xlu0 %1803 }
 0x90b   : > { %4464 = vrcp.f32 %v1804_v46 }
 0x90e   : > { %v4337_v52 = vpop.permute.xlu0 %4336 }
 0x90f   : > { %v4339_v25 = vunpack.i.h.bf16 %v4337_v52  ;;  %v4338_v36 = vunpack.i.l.bf16 %v4337_v52 }
 0x911   : > { %v4114_v53 = vpack.c.bf16 %v4339_v25, %v4338_v36 }
 0x913   : > { %4116 = vmatprep.subr.msk.bf16.mxu1 %vm4736_vm2, %v4114_v53 }
 0x914   : > { %4119 = vmatpush3.bf16.xpose.msk.msra.mxu1 %vm4736_vm2, %v4114_v53 }
 0x915   : > { %v4465_v47 = vpop.eup %4464  ;;  %4122 = vmatprep.subr.msk.bf16.mxu1 %vm4736_vm2, %v4120_v38 }
 0x916   : > { %v1822_v43 = vmul.f32 %v4465_v47, %v4449_v39  ;;  %v1982_v39 = vpop.permute.xlu0 %1981 }
 0x918   : > { %3845 = vmatprep.mubr.msk.f32.mxu1 %vm907_vm3, %v1822_v43 }
 0x919   : > { %3846 = vmatmul.mubr.msk.f32.gmra.mrb[30].mxu1 %vm907_vm3, %v1823_v58 }
 0x91a   : > { %3864 = vmatprep.mubr.msk.f32.mxu1 %vm761_vm1, %v1978_v63  ;;  %v1986_v21 = vpop.permute.xlu0 %1985 }
 0x91c   : > { %4125 = vmatpush3.bf16.xpose.msk.msra.mxu1 %vm4736_vm2, %v4120_v38 }
 0x91d   : > { %4128 = vmatprep.subr.msk.bf16.mxu1 %vm4736_vm2, %v4126_v17 }
 0x91e   : > { %v1990_v28 = vpop.permute.xlu0 %1989 }
 0x924   : > { %4131 = vmatpush3.bf16.xpose.msk.msra.mxu1 %vm4736_vm2, %v4126_v17 }
 0x92b   : > { %3865 = vmatmul.mubr.msk.f32.vlgmr.msra.gmra.mrb[32].mxu1 %vm761_vm1, %v1980_v19 }
 0x92c   : > { %3867 = vmatprep.mubr.msk.f32.mxu1 %vm761_vm1, %v1982_v39 }
 0x92f   : > { %3868 = vmatmul.mubr.msk.f32.gmra.mrb[34].mxu1 %vm761_vm1, %v1984_v12 }
 0x930   : > { %3870 = vmatprep.mubr.msk.f32.mxu1 %vm761_vm1, %v1986_v21 }
 0x933   : > { %3871 = vmatmul.mubr.msk.f32.gmra.mrb[36].mxu1 %vm761_vm1, %v1988_v23 }
 0x934   : > { %3873 = vmatprep.mubr.msk.f32.mxu1 %vm761_vm1, %v1990_v28 }
 0x937   : > { %3874 = vmatmul.mubr.msk.f32.gmra.mrb[38].mxu1 %vm761_vm1, %v1992_v3 }
 0x983   : > { %v5174_v35 = vpop.f32.mrb[24].mxu1 }
 0x984   : > { %v5176_v37 = vpop.f32.mrb[25].mxu1 }
 0x9b7   : > { %v5178_v2 = vpop.f32.mrb[26].mxu1 }
 0x9b8   : > { %v5180_v48 = vpop.f32.mrb[27].mxu1 }
 0x9bb   : > { %v5182_v34 = vpop.f32.mrb[28].mxu1 }
 0x9bc   : > { %v5184_v18 = vpop.f32.mrb[29].mxu1 }
 0x9ec   : > { %v5186_v20 = vpop.f32.mrb[30].mxu1 }
 0x9ed   : > { %v5188_v22 = vpop.f32.mrb[31].mxu1 }
 0x9fe   : > { %v3866_v42 = vpop.f32.mrb[32].mxu1 }
 0x9ff   : > { %v2113_v49 = vadd.f32 %v4530_v45, %v3866_v42  ;;  %v2107_v51 = vpop.f32.mrb[33].mxu1 }
 0xa00   : > { %v2108_v40 = vadd.f32 %v4530_v45, %v2107_v51 }
 0xa01   : > { %v2149_v61 = vsel %vm907_vm3, %v2113_v49, -inf }
 0xa02   : > { %2150 = vmax.xlane.f32.xlu1 %v2149_v61  ;;  %v3869_v60 = vpop.f32.mrb[34].mxu1  ;;  %v2146_v0 = vsel %vm907_vm3, %v2108_v40, -inf }
 0xa03   : > { %v2117_v11 = vpop.f32.mrb[35].mxu1  ;;  %2147 = vmax.xlane.f32.xlu0 %v2146_v0  ;;  %v2123_v24 = vadd.f32 %v4530_v45, %v3869_v60 }
 0xa04   : > { %v2118_v41 = vadd.f32 %v4530_v45, %v2117_v11 }
 0xa05   : > { %v2155_v53 = vsel %vm907_vm3, %v2123_v24, -inf }
 0xa06   : > { %v3872_v46 = vpop.f32.mrb[36].mxu1  ;;  %v2152_v5 = vsel %vm907_vm3, %v2118_v41, -inf }
 0xa07   : > { %v2127_v52 = vpop.f32.mrb[37].mxu1  ;;  %2153 = vmax.xlane.f32.xlu0 %v2152_v5  ;;  %v2133_v4 = vadd.f32 %v4530_v45, %v3872_v46 }
 0xa08   : > { %v2128_v6 = vadd.f32 %v4530_v45, %v2127_v52 }
 0xa09   : > { %v2161_v43 = vsel %vm907_vm3, %v2133_v4, -inf }
 0xa0a   : > { %v3875_v25 = vpop.f32.mrb[38].mxu1  ;;  %v2158_v36 = vsel %vm907_vm3, %v2128_v6, -inf }
 0xa0b   : > { %v2137_v38 = vpop.f32.mrb[39].mxu1  ;;  %2159 = vmax.xlane.f32.xlu1 %v2158_v36  ;;  %2156 = vmax.xlane.f32.xlu0 %v2155_v53  ;;  %v2143_v30 = vadd.f32 %v4530_v45, %v3875_v25 }
 0xa0c   : > { %v2138_v27 = vadd.f32 %v4530_v45, %v2137_v38 }
 0xa0d   : > { %v2167_v32 = vsel %vm907_vm3, %v2143_v30, -inf }
 0xa0e   : > { %v2164_v47 = vsel %vm907_vm3, %v2138_v27, -inf }
 0xa0f   : > { %2165 = vmax.xlane.f32.xlu1 %v2164_v47  ;;  %2162 = vmax.xlane.f32.xlu0 %v2161_v43 }
 0xa13   : > { %2168 = vmax.xlane.f32.xlu0 %v2167_v32 }
 0xa20   : > { %4351 = vrot.lane.b32.xlu1 %v4709_v33, %s4557_s20 }
 0xa8f   : > { %v2151_v1 = vpop.xlane.xlu1 %2150 }
 0xa90   : > { %v2171_v58 = vsub.f32 %v2113_v49, %v2151_v1  ;;  %v2148_v63 = vpop.xlane.xlu0 %2147 }
 0xa91   : > { %v2170_v17 = vsub.f32 %v2108_v40, %v2148_v63 }
 0xa92   : > { %v2180_v19 = vmul.f32 1.442695, %v2171_v58 }
 0xa93   : > { %v2178_v39 = vmul.f32 1.442695, %v2170_v17 }
 0xa94   : > { %4466 = vpow2.f32 %v2180_v19  ;;  %v2154_v12 = vpop.xlane.xlu0 %2153 }
 0xa95   : > { %4468 = vpow2.f32 %v2178_v39  ;;  %v2172_v21 = vsub.f32 %v2118_v41, %v2154_v12 }
 0xa97   : > { %v2182_v23 = vmul.f32 1.442695, %v2172_v21 }
 0xa98   : > { %v2160_v28 = vpop.xlane.xlu1 %2159  ;;  %v2157_v3 = vpop.xlane.xlu0 %2156 }
 0xa99   : > { %4470 = vpow2.f32 %v2182_v23  ;;  %v2174_v42 = vsub.f32 %v2128_v6, %v2160_v28  ;;  %v2173_v45 = vsub.f32 %v2123_v24, %v2157_v3 }
 0xa9b   : > { %v2186_v51 = vmul.f32 1.442695, %v2174_v42  ;;  %v2184_v61 = vmul.f32 1.442695, %v2173_v45 }
 0xa9c   : > { %v2166_v60 = vpop.xlane.xlu1 %2165  ;;  %v2163_v33 = vpop.xlane.xlu0 %2162 }
 0xa9d   : > { %4472 = vpow2.f32 %v2186_v51  ;;  %v2175_v49 = vsub.f32 %v2133_v4, %v2163_v33  ;;  %v2176_v46 = vsub.f32 %v2138_v27, %v2166_v60 }
 0xa9e   : > { %v5201_v0 = vpop.eup %4466  ;;  %4474 = vpow2.f32 %v2184_v61 }
 0xa9f   : > { %v5203_v40 = vpop.eup %4468  ;;  %v2188_v11 = vmul.f32 1.442695, %v2175_v49  ;;  %v2197_v41 = vsel %vm907_vm3, %v5201_v0, 0.0  ;;  %v2190_v47 = vmul.f32 1.442695, %v2176_v46 }
 0xaa0   : > { %v4352_v5 = vpop.permute.xlu1 %4351  ;;  %2198 = vadd.xlane.f32.xlu0 %v2197_v41  ;;  %v2169_v52 = vpop.xlane.xlu0 %2168  ;;  %v2194_v24 = vsel %vm907_vm3, %v5203_v40, 0.0 }
 0xaa1   : > { %v4354_v6 = vunpack.i.h.bf16 %v4352_v5  ;;  %v4353_v25 = vunpack.i.l.bf16 %v4352_v5  ;;  %v2177_v36 = vsub.f32 %v2143_v30, %v2169_v52  ;;  %2195 = vadd.xlane.f32.xlu1 %v2194_v24  ;;  %4476 = vpow2.f32 %v2188_v11  ;;  %v2510_v24 = vld [vmem:[%s5575_s5 + $0x8] sm:$0xff] }
 0xaa3   : > { %v5209_v4 = vpop.eup %4470  ;;  %v4132_v53 = vpack.c.bf16 %v4354_v6, %v4353_v25  ;;  %v2192_v38 = vmul.f32 1.442695, %v2177_v36  ;;  %v2511_v6 = vld [vmem:[%s5575_s5 + $0x10] sm:$0xff]  ;;  %v2512_v36 = vld [vmem:[%s5575_s5 + $0x18] sm:$0xff] }
 0xaa4   : > { %v2200_v43 = vsel %vm907_vm3, %v5209_v4, 0.0 }
 0xaa5   : > { %4478 = vpow2.f32 %v2192_v38  ;;  %4133 = vmatprep.subr.bf16.mxu0 %v4132_v53  ;;  %4180 = vmatprep.subr.bf16.mxu1 %v4132_v53 }
 0xaa6   : > { %2201 = vadd.xlane.f32.xlu1 %v2200_v43  ;;  %4135 = vmatpush3.bf16.msra.mxu0 %v4132_v53  ;;  %4480 = vpow2.f32 %v2190_v47 }
 0xaa7   : > { %v4473_v27 = vpop.eup %4472  ;;  %4184 = vmatpush3.bf16.msra.mxu1 %v4132_v53 }
 0xaa8   : > { %v5213_v32 = vpop.eup %4474  ;;  %v2206_v30 = vsel %vm907_vm3, %v4473_v27, 0.0 }
 0xaa9   : > { %v2203_v1 = vsel %vm907_vm3, %v5213_v32, 0.0 }
 0xaaa   : > { %2207 = vadd.xlane.f32.xlu1 %v2206_v30  ;;  %2204 = vadd.xlane.f32.xlu0 %v2203_v1 }
 0xaab   : > { %v5218_v58 = vpop.eup %4476 }
 0xaac   : > { %v2209_v63 = vsel %vm907_vm3, %v5218_v58, 0.0 }
 0xaae   : > { %2210 = vadd.xlane.f32.xlu0 %v2209_v63 }
 0xaaf   : > { %v5222_v17 = vpop.eup %4478 }
 0xab0   : > { %v2215_v19 = vsel %vm907_vm3, %v5222_v17, 0.0  ;;  %v5226_v39 = vpop.eup %4480 }
 0xab1   : > { %v2212_v12 = vsel %vm907_vm3, %v5226_v39, 0.0 }
 0xab2   : > { %2216 = vadd.xlane.f32.xlu0 %v2215_v19 }
 0xab6   : > { %2213 = vadd.xlane.f32.xlu0 %v2212_v12 }
 0xabb   : > { %4361 = vrot.lane.b32.xlu1 %v4724_v54, %s4557_s20 }
 0xabf   : > { %4366 = vrot.lane.b32.xlu1 %v4729_v62, %s4557_s20 }
 0xac3   : > { %2395 = vrot.lane.b32.xlu1 %v5044_v50, %s4558_s23 }
 0xac7   : > { %2397 = vrot.lane.b32.xlu1 %v5042_v55, %s4558_s23 }
 0xacb   : > { %2429 = vrot.lane.b32.xlu1 %v5174_v35, %s4559_s24 }
 0xacc   : > { %4356 = vrot.lane.b32.xlu0 %v4719_v44, %s4557_s20 }
 0xacf   : > { %2401 = vrot.lane.b32.xlu1 %v5046_v31, %s4558_s23 }
 0xad0   : > { %2427 = vrot.lane.b32.xlu0 %v5176_v37, %s4559_s24 }
 0xad3   : > { %2433 = vrot.lane.b32.xlu1 %v5178_v2, %s4559_s24 }
 0xad4   : > { %2399 = vrot.lane.b32.xlu0 %v5048_v56, %s4558_s23 }
 0xad7   : > { %2405 = vrot.lane.b32.xlu1 %v5050_v57, %s4558_s23 }
 0xad8   : > { %2431 = vrot.lane.b32.xlu0 %v5180_v48, %s4559_s24 }
 0xadb   : > { %2437 = vrot.lane.b32.xlu1 %v5182_v34, %s4559_s24 }
 0xadc   : > { %2403 = vrot.lane.b32.xlu0 %v5052_v59, %s4558_s23 }
 0xadf   : > { %2409 = vrot.lane.b32.xlu1 %v5054_v29, %s4558_s23 }
 0xae0   : > { %2435 = vrot.lane.b32.xlu0 %v5184_v18, %s4559_s24 }
 0xae3   : > { %2441 = vrot.lane.b32.xlu1 %v5186_v20, %s4559_s24 }
 0xae4   : > { %2407 = vrot.lane.b32.xlu0 %v5056_v26, %s4558_s23 }
 0xae8   : > { %2439 = vrot.lane.b32.xlu0 %v5188_v22, %s4559_s24 }
 0xb2d   : > { %v2199_v54 = vpop.xlane.xlu0 %2198 }
 0xb2e   : > { %v2196_v44 = vpop.xlane.xlu1 %2195 }
 0xb2f   : > { %4482 = vrcp.f32 %v2196_v44 }
 0xb33   : > { %v2202_v62 = vpop.xlane.xlu1 %2201 }
 0xb37   : > { %v2208_v55 = vpop.xlane.xlu1 %2207  ;;  %v2205_v50 = vpop.xlane.xlu0 %2204 }
 0xb38   : > { %4484 = vrcp.f32 %v2208_v55 }
 0xb39   : > { %v4483_v31 = vpop.eup %4482  ;;  %4486 = vrcp.f32 %v2199_v54 }
 0xb3a   : > { %v2226_v56 = vmul.f32 %v4483_v31, %v5203_v40  ;;  %4488 = vrcp.f32 %v2202_v62 }
 0xb3b   : > { %v2211_v57 = vpop.xlane.xlu0 %2210  ;;  %v4362_v35 = vpop.permute.xlu1 %4361 }
 0xb3c   : > { %3892 = vmatprep.mubr.msk.f32.mxu0 %vm907_vm3, %v2226_v56  ;;  %v4364_v48 = vunpack.i.h.bf16 %v4362_v35  ;;  %v4363_v34 = vunpack.i.l.bf16 %v4362_v35  ;;  %4490 = vrcp.f32 %v2211_v57 }
 0xb3e   : > { %v4140_v23 = vpack.c.bf16 %v4364_v48, %v4363_v34 }
 0xb3f   : > { %v2217_v59 = vpop.xlane.xlu0 %2216  ;;  %v4367_v22 = vpop.permute.xlu1 %4366 }
 0xb40   : > { %v4369_v28 = vunpack.i.h.bf16 %v4367_v22  ;;  %v4368_v3 = vunpack.i.l.bf16 %v4367_v22 }
 0xb42   : > { %v4485_v29 = vpop.eup %4484  ;;  %v4144_v45 = vpack.c.bf16 %v4369_v28, %v4368_v3 }
 0xb43   : > { %v2214_v37 = vpop.xlane.xlu0 %2213  ;;  %v2230_v26 = vmul.f32 %v4485_v29, %v4473_v27  ;;  %v4487_v42 = vpop.eup %4486 }
 0xb44   : > { %4492 = vrcp.f32 %v2214_v37  ;;  %v4489_v51 = vpop.eup %4488  ;;  %v2227_v49 = vmul.f32 %v4487_v42, %v5201_v0  ;;  %v2509_v0 = vld [vmem:[%s5575_s5] sm:$0xff] }
 0xb45   : > { %3898 = vmatprep.mubr.msk.f32.mxu1 %vm907_vm3, %v2230_v26  ;;  %4494 = vrcp.f32 %v2205_v50  ;;  %v2228_v41 = vmul.f32 %v4489_v51, %v5209_v4  ;;  %v4148_v25 = vpack.c.bf16 %v2510_v24, %v2509_v0  ;;  %v4152_v4 = vpack.c.bf16 %v2512_v36, %v2511_v6 }
 0xb46   : > { %4496 = vrcp.f32 %v2217_v59  ;;  %v4491_v61 = vpop.eup %4490 }
 0xb47   : > { %v4357_v2 = vpop.permute.xlu0 %4356  ;;  %v2231_v40 = vmul.f32 %v4491_v61, %v5218_v58  ;;  %v2396_v58 = vpop.permute.xlu1 %2395 }
 0xb48   : > { %v4359_v18 = vunpack.i.h.bf16 %v4357_v2  ;;  %v4358_v20 = vunpack.i.l.bf16 %v4357_v2  ;;  %v2483_v35 = vsel %vm761_vm1, %v4912_v8, %v2396_v58 }
 0xb4a   : > { %v4136_v21 = vpack.c.bf16 %v4359_v18, %v4358_v20 }
 0xb4b   : > { %v2398_v63 = vpop.permute.xlu1 %2397  ;;  %v2428_v19 = vpop.permute.xlu0 %2427 }
 0xb4c   : > { %4137 = vmatprep.subr.bf16.mxu0 %v4136_v21  ;;  %4181 = vmatprep.subr.bf16.mxu1 %v4136_v21  ;;  %v2484_v26 = vsel %vm761_vm1, %v4910_v7, %v2398_v63  ;;  %v2492_v2 = vsel %vm2491_vm4, %v2483_v35, %v2428_v19 }
 0xb4d   : > { %4139 = vmatpush3.bf16.msra.mxu0 %v4136_v21  ;;  %4185 = vmatpush3.bf16.msra.mxu1 %v4136_v21 }
 0xb4e   : > { %4141 = vmatprep.subr.bf16.mxu0 %v4140_v23  ;;  %4182 = vmatprep.subr.bf16.mxu1 %v4140_v23  ;;  %v4493_v60 = vpop.eup %4492 }
 0xb4f   : > { %v4495_v33 = vpop.eup %4494  ;;  %v2232_v46 = vmul.f32 %v4493_v60, %v5226_v39  ;;  %v2400_v12 = vpop.permute.xlu0 %2399 }
 0xb50   : > { %v4497_v11 = vpop.eup %4496  ;;  %v2229_v5 = vmul.f32 %v4495_v33, %v5213_v32  ;;  %v2485_v22 = vsel %vm761_vm1, %v4916_v10, %v2400_v12 }
 0xb51   : > { %4143 = vmatpush3.bf16.msra.mxu0 %v4140_v23  ;;  %4186 = vmatpush3.bf16.msra.mxu1 %v4140_v23  ;;  %v2233_v52 = vmul.f32 %v4497_v11, %v5222_v17  ;;  %v2430_v17 = vpop.permute.xlu1 %2429 }
 0xb52   : > { %4145 = vmatprep.subr.bf16.mxu0 %v4144_v45  ;;  %4183 = vmatprep.subr.bf16.mxu1 %v4144_v45  ;;  %v2493_v34 = vsel %vm2491_vm4, %v2484_v26, %v2430_v17  ;;  %v4534_v17 = vld [vmem:[%s4658_s18 + $0x18] sm:$0xff]  ;;  %v4537_v26 = vld [vmem:[%s4658_s18 + $0x30] sm:$0xff] }
 0xb53   : > { %v2432_v54 = vpop.permute.xlu0 %2431 }
 0xb54   : > { %v2494_v21 = vsel %vm2491_vm4, %v2485_v22, %v2432_v54 }
 0xb55   : > { %4147 = vmatpush3.bf16.msra.mxu0 %v4144_v45  ;;  %4187 = vmatpush3.bf16.msra.mxu1 %v4144_v45  ;;  %v2402_v39 = vpop.permute.xlu1 %2401 }
 0xb56   : > { %4149 = vmatprep.subr.bf16.mxu0 %v4148_v25  ;;  %v2486_v7 = vsel %vm761_vm1, %v4914_v9, %v2402_v39 }
 0xb57   : > { %v2404_v55 = vpop.permute.xlu0 %2403 }
 0xb58   : > { %3893 = vmatmul.mubr.msk.f32.vlgmr.msra.gmra.mrb[32].mxu0 %vm907_vm3, %v2227_v49  ;;  %3899 = vmatmul.mubr.msk.f32.vlgmr.msra.gmra.mrb[40].mxu1 %vm907_vm3, %v2231_v40  ;;  %v2487_v10 = vsel %vm761_vm1, %v4920_v14, %v2404_v55 }
 0xb59   : > { %3895 = vmatprep.mubr.msk.f32.mxu0 %vm907_vm3, %v2228_v41  ;;  %3901 = vmatprep.mubr.msk.f32.mxu1 %vm907_vm3, %v2232_v46  ;;  %v2434_v44 = vpop.permute.xlu1 %2433 }
 0xb5a   : > { %4151 = vmatpush3.bf16.msra.mxu0 %v4148_v25  ;;  %v2495_v28 = vsel %vm2491_vm4, %v2486_v7, %v2434_v44  ;;  %v4531_v25 = vld [vmem:[%s4658_s18 + $0x8] sm:$0xff] }
 0xb5b   : > { %4153 = vmatprep.subr.bf16.mxu0 %v4152_v4  ;;  %v2436_v31 = vpop.permute.xlu0 %2435 }
 0xb5c   : > { %3896 = vmatmul.mubr.msk.f32.gmra.mrb[34].mxu0 %vm907_vm3, %v2229_v5  ;;  %3902 = vmatmul.mubr.msk.f32.gmra.mrb[42].mxu1 %vm907_vm3, %v2233_v52  ;;  %v2496_v51 = vsel %vm2491_vm4, %v2487_v10, %v2436_v31 }
 0xb5d   : > { %v2406_v62 = vpop.permute.xlu1 %2405 }
 0xb5e   : > { %4155 = vmatpush3.bf16.msra.mxu0 %v4152_v4  ;;  %v2488_v9 = vsel %vm761_vm1, %v4918_v13, %v2406_v62  ;;  %v4532_v4 = vld [vmem:[%s4658_s18] sm:$0xff] }
 0xb5f   : > { %v2408_v57 = vpop.permute.xlu0 %2407  ;;  %v4535_v62 = vld [vmem:[%s4658_s18 + $0x20] sm:$0xff] }
 0xb60   : > { %v2489_v14 = vsel %vm761_vm1, %v4924_v16, %v2408_v57  ;;  %v3413_v16 = vld [vmem:[%s5576_s6] ss:$0 sm:$0xff]  ;;  %v4536_v57 = vld [vmem:[%s4658_s18 + $0x28] sm:$0xff] }
 0xb61   : > { %v2438_v50 = vpop.permute.xlu1 %2437 }
 0xb62   : > { %v2497_v60 = vsel %vm2491_vm4, %v2488_v9, %v2438_v50 }
 0xb63   : > { %v2440_v29 = vpop.permute.xlu0 %2439 }
 0xb64   : > { %v2498_v11 = vsel %vm2491_vm4, %v2489_v14, %v2440_v29 }
 0xb65   : > { %v2410_v56 = vpop.permute.xlu1 %2409 }
 0xb66   : > { %v2490_v13 = vsel %vm761_vm1, %v4922_v15, %v2410_v56 }
 0xb69   : > { %v2442_v59 = vpop.permute.xlu1 %2441 }
 0xb6a   : > { %v2499_v46 = vsel %vm2491_vm4, %v2490_v13, %v2442_v59 }
 0xc2b   : > { %v3894_v53 = vpop.f32.mrb[32].mxu0  ;;  %v3900_v38 = vpop.f32.mrb[40].mxu1 }
 0xc2c   : > { %v2368_v47 = vpop.f32.mrb[41].mxu1  ;;  %2461 = vrot.lane.b32.xlu1 %v3894_v53, %s4560_s16  ;;  %v2348_v43 = vpop.f32.mrb[33].mxu0 }
 0xc2d   : > { %2459 = vrot.lane.b32.xlu0 %v2348_v43, %s4560_s16 }
 0xc2f   : > { %v3897_v27 = vpop.f32.mrb[34].mxu0  ;;  %v3903_v32 = vpop.f32.mrb[42].mxu1 }
 0xc30   : > { %v2378_v30 = vpop.f32.mrb[43].mxu1  ;;  %2465 = vrot.lane.b32.xlu1 %v3897_v27, %s4560_s16  ;;  %v2358_v1 = vpop.f32.mrb[35].mxu0 }
 0xc31   : > { %2463 = vrot.lane.b32.xlu0 %v2358_v1, %s4560_s16  ;;  %v4533_v1 = vld [vmem:[%s4658_s18 + $0x10] sm:$0xff] }
 0xc34   : > { %2469 = vrot.lane.b32.xlu1 %v3900_v38, %s4560_s16 }
 0xc35   : > { %2467 = vrot.lane.b32.xlu0 %v2368_v47, %s4560_s16 }
 0xc38   : > { %2473 = vrot.lane.b32.xlu1 %v3903_v32, %s4560_s16 }
 0xc39   : > { %2471 = vrot.lane.b32.xlu0 %v2378_v30, %s4560_s16 }
 0xc9e   : > { %v2462_v37 = vpop.permute.xlu1 %2461 }
 0xc9f   : > { %v2460_v48 = vpop.permute.xlu0 %2459  ;;  %v2502_v20 = vsel %vm2500_vm5, %v2493_v34, %v2462_v37 }
 0xca0   : > { %v2501_v18 = vsel %vm2500_vm5, %v2492_v2, %v2460_v48  ;;  %v4538_v48 = vld [vmem:[%s4658_s18 + $0x38] sm:$0xff] }
 0xca1   : > { %3912 = vmatprep.mubr.msk.f32.mxu0 %vm456_vm0, %v2501_v18 }
 0xca2   : > { %3913 = vmatmul.mubr.msk.f32.vlgmr.msra.gmra.mrb[36].mxu0 %vm456_vm0, %v2502_v20  ;;  %v2466_v8 = vpop.permute.xlu1 %2465 }
 0xca3   : > { %v2464_v23 = vpop.permute.xlu0 %2463  ;;  %v2504_v42 = vsel %vm2500_vm5, %v2495_v28, %v2466_v8 }
 0xca4   : > { %v2503_v3 = vsel %vm2500_vm5, %v2494_v21, %v2464_v23 }
 0xca5   : > { %3915 = vmatprep.mubr.msk.f32.mxu0 %vm456_vm0, %v2503_v3 }
 0xca6   : > { %v2470_v45 = vpop.permute.xlu1 %2469  ;;  %3916 = vmatmul.mubr.msk.f32.gmra.mrb[38].mxu0 %vm456_vm0, %v2504_v42 }
 0xca7   : > { %v2468_v61 = vpop.permute.xlu0 %2467  ;;  %v2506_v49 = vsel %vm2500_vm5, %v2497_v60, %v2470_v45 }
 0xca8   : > { %v2505_v33 = vsel %vm2500_vm5, %v2496_v51, %v2468_v61 }
 0xca9   : > { %3918 = vmatprep.mubr.msk.f32.mxu0 %vm456_vm0, %v2505_v33 }
 0xcaa   : > { %v2474_v40 = vpop.permute.xlu1 %2473  ;;  %3919 = vmatmul.mubr.msk.f32.gmra.mrb[40].mxu0 %vm456_vm0, %v2506_v49 }
 0xcab   : > { %v2472_v41 = vpop.permute.xlu0 %2471  ;;  %v2508_v52 = vsel %vm2500_vm5, %v2499_v46, %v2474_v40 }
 0xcac   : > { %v2507_v5 = vsel %vm2500_vm5, %v2498_v11, %v2472_v41 }
 0xcad   : > { %3921 = vmatprep.mubr.msk.f32.mxu0 %vm456_vm0, %v2507_v5 }
 0xcae   : > { %3922 = vmatmul.mubr.msk.f32.gmra.mrb[42].mxu0 %vm456_vm0, %v2508_v52 }
 0xd75   : > { %v3914_v0 = vpop.f32.mrb[36].mxu0 }
 0xd76   : > { %v2616_v15 = vadd.f32 %v3914_v0, %v3413_v16  ;;  %v2610_v24 = vpop.f32.mrb[37].mxu0 }
 0xd77   : > { %v2611_v6 = vadd.f32 %v3413_v16, %v2610_v24 }
 0xd78   : > { %v2650_v36 = vadd.f32 %v4531_v25, %v2616_v15 }
 0xd79   : > { %v2649_v53 = vadd.f32 %v4532_v4, %v2611_v6  ;;  %v3917_v38 = vpop.f32.mrb[38].mxu0 }
 0xd7a   : > { %v2626_v47 = vadd.f32 %v3917_v38, %v3413_v16  ;;  %v2620_v43 = vpop.f32.mrb[39].mxu0  ;;  %v2662_v27 = vsel %vm456_vm0, %v2650_v36, 0.0 }
 0xd7b   : > { %v2621_v32 = vadd.f32 %v3413_v16, %v2620_v43  ;;  %2663 = vadd.xlane.f32.xlu1 %v2662_v27  ;;  %v2659_v30 = vsel %vm456_vm0, %v2649_v53, 0.0 }
 0xd7c   : > { %2660 = vadd.xlane.f32.xlu0 %v2659_v30  ;;  %v2652_v19 = vadd.f32 %v4534_v17, %v2626_v47  ;;  %v2789_v17 = vld [vmem:[%s5578_s8 + $0x8] sm:$0xff] }
 0xd7d   : > { %v2651_v58 = vadd.f32 %v4533_v1, %v2621_v32  ;;  %v3920_v63 = vpop.f32.mrb[40].mxu0 }
 0xd7e   : > { %v2630_v39 = vpop.f32.mrb[41].mxu0  ;;  %v2636_v12 = vadd.f32 %v3920_v63, %v3413_v16  ;;  %v2668_v56 = vsel %vm456_vm0, %v2652_v19, 0.0  ;;  %v2788_v63 = vld [vmem:[%s5578_s8] sm:$0xff] }
 0xd7f   : > { %v2631_v44 = vadd.f32 %v3413_v16, %v2630_v39  ;;  %v2665_v54 = vsel %vm456_vm0, %v2651_v58, 0.0  ;;  %v2790_v39 = vld [vmem:[%s5578_s8 + $0x10] sm:$0xff] }
 0xd80   : > { %2666 = vadd.xlane.f32.xlu0 %v2665_v54  ;;  %v2654_v59 = vadd.f32 %v4536_v57, %v2636_v12  ;;  %v2791_v12 = vld [vmem:[%s5578_s8 + $0x18] sm:$0xff]  ;;  %v2936_v54 = vld [vmem:[%s5580_s10] sm:$0xff] }
 0xd81   : > { %v2653_v55 = vadd.f32 %v4535_v62, %v2631_v44  ;;  %v3923_v50 = vpop.f32.mrb[42].mxu0  ;;  %v4160_v44 = vpack.c.bf16 %v2791_v12, %v2790_v39  ;;  %v2937_v62 = vld [vmem:[%s5580_s10 + $0x8] sm:$0xff]  ;;  %v2940_v57 = vld [vmem:[%s5580_s10 + $0x20] sm:$0xff] }
 0xd82   : > { %v2640_v31 = vpop.f32.mrb[43].mxu0  ;;  %v2646_v29 = vadd.f32 %v3923_v50, %v3413_v16  ;;  %v2674_v20 = vsel %vm456_vm0, %v2654_v59, 0.0  ;;  %v4164_v50 = vpack.c.bf16 %v2937_v62, %v2936_v54 }
 0xd83   : > { %v2641_v35 = vadd.f32 %v3413_v16, %v2640_v31  ;;  %v2671_v37 = vsel %vm456_vm0, %v2653_v55, 0.0  ;;  %v2939_v31 = vld [vmem:[%s5580_s10 + $0x18] sm:$0xff] }
 0xd84   : > { %2672 = vadd.xlane.f32.xlu1 %v2671_v37  ;;  %2669 = vadd.xlane.f32.xlu0 %v2668_v56  ;;  %v2656_v34 = vadd.f32 %v4538_v48, %v2646_v29 }
 0xd85   : > { %v2655_v2 = vadd.f32 %v4537_v26, %v2641_v35  ;;  %4165 = vmatprep.subr.bf16.mxu0 %v4164_v50 }
 0xd86   : > { %v2680_v22 = vsel %vm456_vm0, %v2656_v34, 0.0  ;;  %4167 = vmatpush3.bf16.msra.mxu0 %v4164_v50 }
 0xd87   : > { %v2677_v18 = vsel %vm456_vm0, %v2655_v2, 0.0 }
 0xd88   : > { %2678 = vadd.xlane.f32.xlu1 %v2677_v18  ;;  %2675 = vadd.xlane.f32.xlu0 %v2674_v20 }
 0xd8c   : > { %2681 = vadd.xlane.f32.xlu0 %v2680_v22 }
 0xe08   : > { %v2664_v8 = vpop.xlane.xlu1 %2663 }
 0xe09   : > { %v2685_v7 = vmul.f32 0.03125, %v2664_v8  ;;  %v2661_v21 = vpop.xlane.xlu0 %2660 }
 0xe0a   : > { %v2684_v23 = vmul.f32 0.03125, %v2661_v21 }
 0xe0b   : > { %v5338_v28 = vsub.f32 %v2650_v36, %v2685_v7 }
 0xe0c   : > { %v5340_v3 = vsub.f32 %v2649_v53, %v2684_v23 }
 0xe0d   : > { %v2667_v42 = vpop.xlane.xlu0 %2666  ;;  %v2701_v10 = vmul.f32 %v5338_v28, %v5338_v28 }
 0xe0e   : > { %v2686_v45 = vmul.f32 0.03125, %v2667_v42  ;;  %v2700_v9 = vmul.f32 %v5340_v3, %v5340_v3 }
 0xe0f   : > { %v2711_v51 = vsel %vm456_vm0, %v2701_v10, 0.0 }
 0xe10   : > { %v5347_v61 = vsub.f32 %v2651_v58, %v2686_v45  ;;  %2712 = vadd.xlane.f32.xlu0 %v2711_v51  ;;  %v2708_v60 = vsel %vm456_vm0, %v2700_v9, 0.0 }
 0xe11   : > { %v2673_v33 = vpop.xlane.xlu1 %2672  ;;  %2709 = vadd.xlane.f32.xlu1 %v2708_v60  ;;  %v2670_v49 = vpop.xlane.xlu0 %2669 }
 0xe12   : > { %v2688_v14 = vmul.f32 0.03125, %v2673_v33  ;;  %v2687_v40 = vmul.f32 0.03125, %v2670_v49  ;;  %v2702_v13 = vmul.f32 %v5347_v61, %v5347_v61  ;;  %v3422_v49 = vld [vmem:[%s5577_s7] ss:$0 sm:$0xff] }
 0xe14   : > { %v5352_v11 = vsub.f32 %v2653_v55, %v2688_v14  ;;  %v5354_v41 = vsub.f32 %v2652_v19, %v2687_v40  ;;  %v2714_v46 = vsel %vm456_vm0, %v2702_v13, 0.0  ;;  %v4156_v19 = vpack.c.bf16 %v2789_v17, %v2788_v63  ;;  %v2938_v55 = vld [vmem:[%s5580_s10 + $0x10] sm:$0xff] }
 0xe15   : > { %v2679_v5 = vpop.xlane.xlu1 %2678  ;;  %2715 = vadd.xlane.f32.xlu1 %v2714_v46  ;;  %v2676_v52 = vpop.xlane.xlu0 %2675  ;;  %v4168_v56 = vpack.c.bf16 %v2939_v31, %v2938_v55  ;;  %v2942_v31 = vld [vmem:[%s5580_s10 + $0x30] sm:$0xff] }
 0xe16   : > { %v2690_v16 = vmul.f32 0.03125, %v2679_v5  ;;  %v2689_v0 = vmul.f32 0.03125, %v2676_v52  ;;  %v2704_v15 = vmul.f32 %v5352_v11, %v5352_v11  ;;  %v2703_v24 = vmul.f32 %v5354_v41, %v5354_v41  ;;  %4157 = vmatprep.subr.bf16.mxu1 %v4156_v19 }
 0xe17   : > { %4159 = vmatpush3.bf16.msra.mxu1 %v4156_v19  ;;  %4169 = vmatprep.subr.bf16.mxu0 %v4168_v56 }
 0xe18   : > { %v5361_v6 = vsub.f32 %v2655_v2, %v2690_v16  ;;  %v5363_v25 = vsub.f32 %v2654_v59, %v2689_v0  ;;  %v2720_v36 = vsel %vm456_vm0, %v2704_v15, 0.0  ;;  %v2717_v4 = vsel %vm456_vm0, %v2703_v24, 0.0  ;;  %4161 = vmatprep.subr.bf16.mxu1 %v4160_v44  ;;  %v2941_v59 = vld [vmem:[%s5580_s10 + $0x28] sm:$0xff]  ;;  %4171 = vmatpush3.bf16.msra.mxu0 %v4168_v56  ;;  %v3423_v16 = vld [vmem:[%s5577_s7 + $0x1] ss:$0 sm:$0xff] }
 0xe19   : > { %2721 = vadd.xlane.f32.xlu1 %v2720_v36  ;;  %2718 = vadd.xlane.f32.xlu0 %v2717_v4  ;;  %v2682_v53 = vpop.xlane.xlu0 %2681  ;;  %v4172_v29 = vpack.c.bf16 %v2941_v59, %v2940_v57  ;;  %v3424_v57 = vld [vmem:[%s5579_s9] ss:$0 sm:$0xff] }
 0xe1a   : > { %v2691_v38 = vmul.f32 0.03125, %v2682_v53  ;;  %v2706_v47 = vmul.f32 %v5361_v6, %v5361_v6  ;;  %v2705_v43 = vmul.f32 %v5363_v25, %v5363_v25 }
 0xe1b   : > { %4163 = vmatpush3.bf16.msra.mxu1 %v4160_v44  ;;  %4173 = vmatprep.subr.bf16.mxu0 %v4172_v29 }
 0xe1c   : > { %v5371_v27 = vsub.f32 %v2656_v34, %v2691_v38  ;;  %v2726_v32 = vsel %vm456_vm0, %v2706_v47, 0.0  ;;  %v2723_v30 = vsel %vm456_vm0, %v2705_v43, 0.0  ;;  %4175 = vmatpush3.bf16.msra.mxu0 %v4172_v29 }
 0xe1d   : > { %2727 = vadd.xlane.f32.xlu1 %v2726_v32  ;;  %2724 = vadd.xlane.f32.xlu0 %v2723_v30 }
 0xe1e   : > { %v2707_v1 = vmul.f32 %v5371_v27, %v5371_v27 }
 0xe20   : > { %v2729_v58 = vsel %vm456_vm0, %v2707_v1, 0.0 }
 0xe21   : > { %2730 = vadd.xlane.f32.xlu0 %v2729_v58 }
 0xe9d   : > { %v2713_v35 = vpop.xlane.xlu0 %2712 }
 0xe9e   : > { %v2733_v37 = vmul.f32 0.03125, %v2713_v35  ;;  %v2710_v26 = vpop.xlane.xlu1 %2709 }
 0xe9f   : > { %v2732_v2 = vmul.f32 0.03125, %v2710_v26 }
 0xea0   : > { %v2741_v48 = vadd.f32 1e-05, %v2733_v37 }
 0xea1   : > { %v2740_v34 = vadd.f32 1e-05, %v2732_v2 }
 0xea2   : > { %4498 = vrsqrt.f32 %v2741_v48  ;;  %v2716_v18 = vpop.xlane.xlu1 %2715 }
 0xea3   : > { %4500 = vrsqrt.f32 %v2740_v34  ;;  %v2734_v20 = vmul.f32 0.03125, %v2716_v18 }
 0xea5   : > { %v2742_v22 = vadd.f32 1e-05, %v2734_v20 }
 0xea6   : > { %v2722_v8 = vpop.xlane.xlu1 %2721  ;;  %v2719_v7 = vpop.xlane.xlu0 %2718 }
 0xea7   : > { %4502 = vrsqrt.f32 %v2742_v22  ;;  %v2736_v21 = vmul.f32 0.03125, %v2722_v8  ;;  %v2735_v23 = vmul.f32 0.03125, %v2719_v7 }
 0xea9   : > { %v2744_v42 = vadd.f32 1e-05, %v2736_v21  ;;  %v2743_v10 = vadd.f32 1e-05, %v2735_v23 }
 0xeaa   : > { %v2728_v45 = vpop.xlane.xlu1 %2727  ;;  %v2725_v9 = vpop.xlane.xlu0 %2724 }
 0xeab   : > { %4504 = vrsqrt.f32 %v2744_v42  ;;  %v2738_v51 = vmul.f32 0.03125, %v2728_v45  ;;  %v2737_v60 = vmul.f32 0.03125, %v2725_v9 }
 0xeac   : > { %v4499_v33 = vpop.eup %4498  ;;  %4506 = vrsqrt.f32 %v2743_v10 }
 0xead   : > { %v4501_v14 = vpop.eup %4500  ;;  %v2757_v40 = vmul.f32 %v4499_v33, %v5338_v28  ;;  %v2746_v13 = vadd.f32 1e-05, %v2738_v51  ;;  %v2745_v46 = vadd.f32 1e-05, %v2737_v60 }
 0xeae   : > { %v2731_v5 = vpop.xlane.xlu0 %2730  ;;  %v2756_v52 = vmul.f32 %v4501_v14, %v5340_v3 }
 0xeaf   : > { %v2769_v0 = vmul.f32 %v3422_v49, %v2757_v40  ;;  %4508 = vrsqrt.f32 %v2746_v13  ;;  %v2739_v15 = vmul.f32 0.03125, %v2731_v5  ;;  %v3433_v40 = vld [vmem:[%s5581_s11] ss:$0 sm:$0xff] }
 0xeb0   : > { %4510 = vrsqrt.f32 %v2745_v46  ;;  %v2768_v24 = vmul.f32 %v3422_v49, %v2756_v52 }
 0xeb1   : > { %v4503_v36 = vpop.eup %4502  ;;  %v2747_v4 = vadd.f32 1e-05, %v2739_v15  ;;  %v5419_v38 = vadd.f32 %v3423_v16, %v2769_v0 }
 0xeb2   : > { %v5416_v53 = vadd.f32 %v3423_v16, %v2768_v24  ;;  %v2758_v28 = vmul.f32 %v4503_v36, %v5347_v61 }
 0xeb3   : > { %4512 = vrsqrt.f32 %v2747_v4 }
 0xeb4   : > { %3932 = vmatprep.mubr.msk.f32.mxu1 %vm456_vm0, %v5416_v53  ;;  %v2770_v3 = vmul.f32 %v3422_v49, %v2758_v28 }
 0xeb5   : > { %v4505_v47 = vpop.eup %4504  ;;  %3933 = vmatmul.mubr.msk.f32.vlgmr.msra.gmra.mrb[44].mxu1 %vm456_vm0, %v5419_v38 }
 0xeb6   : > { %v4507_v43 = vpop.eup %4506  ;;  %v5425_v32 = vadd.f32 %v3423_v16, %v2770_v3  ;;  %v2760_v30 = vmul.f32 %v4505_v47, %v5352_v11 }
 0xeb7   : > { %v2759_v1 = vmul.f32 %v4507_v43, %v5354_v41 }
 0xeb8   : > { %3935 = vmatprep.mubr.msk.f32.mxu1 %vm456_vm0, %v5425_v32  ;;  %v2772_v61 = vmul.f32 %v3422_v49, %v2760_v30 }
 0xeb9   : > { %v4509_v58 = vpop.eup %4508  ;;  %v2771_v63 = vmul.f32 %v3422_v49, %v2759_v1 }
 0xeba   : > { %v4511_v17 = vpop.eup %4510  ;;  %v5431_v19 = vadd.f32 %v3423_v16, %v2772_v61  ;;  %v2762_v39 = vmul.f32 %v4509_v58, %v5361_v6 }
 0xebb   : > { %v5434_v12 = vadd.f32 %v3423_v16, %v2771_v63  ;;  %v2761_v44 = vmul.f32 %v4511_v17, %v5363_v25 }
 0xebc   : > { %v2774_v54 = vmul.f32 %v3422_v49, %v2762_v39 }
 0xebd   : > { %v4513_v62 = vpop.eup %4512  ;;  %3936 = vmatmul.mubr.msk.f32.gmra.mrb[46].mxu1 %vm456_vm0, %v5434_v12  ;;  %v2773_v11 = vmul.f32 %v3422_v49, %v2761_v44 }
 0xebe   : > { %3938 = vmatprep.mubr.msk.f32.mxu1 %vm456_vm0, %v5431_v19  ;;  %v5441_v41 = vadd.f32 %v3423_v16, %v2774_v54  ;;  %v2763_v55 = vmul.f32 %v4513_v62, %v5371_v27  ;;  %v2943_v27 = vld [vmem:[%s5580_s10 + $0x38] sm:$0xff] }
 0xebf   : > { %v5444_v50 = vadd.f32 %v3423_v16, %v2773_v11  ;;  %v4176_v56 = vpack.c.bf16 %v2943_v27, %v2942_v31 }
 0xec0   : > { %v2775_v6 = vmul.f32 %v3422_v49, %v2763_v55 }
 0xec1   : > { %3939 = vmatmul.mubr.msk.f32.gmra.mrb[48].mxu1 %vm456_vm0, %v5444_v50  ;;  %4177 = vmatprep.subr.bf16.mxu0 %v4176_v56 }
 0xec2   : > { %3941 = vmatprep.mubr.msk.f32.mxu1 %vm456_vm0, %v5441_v41  ;;  %v5450_v25 = vadd.f32 %v3423_v16, %v2775_v6  ;;  %4179 = vmatpush3.bf16.msra.mxu0 %v4176_v56 }
 0xec5   : > { %3942 = vmatmul.mubr.msk.f32.gmra.mrb[50].mxu1 %vm456_vm0, %v5450_v25 }
 0xf88   : > { %v3934_v59 = vpop.f32.mrb[44].mxu1 }
 0xf89   : > { %v2895_v29 = vadd.f32 %v3934_v59, %v3424_v57  ;;  %v2889_v35 = vpop.f32.mrb[45].mxu1 }
 0xf8a   : > { %v2890_v37 = vadd.f32 %v3424_v57, %v2889_v35 }
 0xf8b   : > { %v2929_v2 = vmax.f32 %v2895_v29, 0.0 }
 0xf8c   : > { %v2928_v26 = vmax.f32 %v2890_v37, 0.0 }
 0xf8e   : > { %3960 = vmatprep.mubr.msk.f32.mxu0 %vm907_vm3, %v2928_v26 }
 0xf8f   : > { %3961 = vmatmul.mubr.msk.f32.vlgmr.msra.gmra.mrb[44].mxu0 %vm907_vm3, %v2929_v2 }
 0xf90   : > { %v3937_v48 = vpop.f32.mrb[46].mxu1 }
 0xf91   : > { %v2905_v34 = vadd.f32 %v3937_v48, %v3424_v57  ;;  %v2899_v18 = vpop.f32.mrb[47].mxu1 }
 0xf92   : > { %v2900_v20 = vadd.f32 %v3424_v57, %v2899_v18 }
 0xf93   : > { %v2931_v7 = vmax.f32 %v2905_v34, 0.0 }
 0xf94   : > { %v2930_v22 = vmax.f32 %v2900_v20, 0.0  ;;  %v3940_v8 = vpop.f32.mrb[48].mxu1 }
 0xf95   : > { %v2915_v21 = vadd.f32 %v3940_v8, %v3424_v57  ;;  %v2909_v23 = vpop.f32.mrb[49].mxu1 }
 0xf96   : > { %v2910_v42 = vadd.f32 %v3424_v57, %v2909_v23  ;;  %3963 = vmatprep.mubr.msk.f32.mxu0 %vm907_vm3, %v2930_v22 }
 0xf97   : > { %3964 = vmatmul.mubr.msk.f32.gmra.mrb[46].mxu0 %vm907_vm3, %v2931_v7  ;;  %v2933_v9 = vmax.f32 %v2915_v21, 0.0 }
 0xf98   : > { %v2932_v10 = vmax.f32 %v2910_v42, 0.0  ;;  %v3943_v45 = vpop.f32.mrb[50].mxu1 }
 0xf99   : > { %v2925_v51 = vadd.f32 %v3943_v45, %v3424_v57  ;;  %v2919_v60 = vpop.f32.mrb[51].mxu1 }
 0xf9a   : > { %v2920_v33 = vadd.f32 %v3424_v57, %v2919_v60  ;;  %3966 = vmatprep.mubr.msk.f32.mxu0 %vm907_vm3, %v2932_v10 }
 0xf9b   : > { %3967 = vmatmul.mubr.msk.f32.gmra.mrb[48].mxu0 %vm907_vm3, %v2933_v9  ;;  %v2935_v14 = vmax.f32 %v2925_v51, 0.0 }
 0xf9c   : > { %v2934_v49 = vmax.f32 %v2920_v33, 0.0 }
 0xf9e   : > { %3969 = vmatprep.mubr.msk.f32.mxu0 %vm907_vm3, %v2934_v49 }
 0xf9f   : > { %3970 = vmatmul.mubr.msk.f32.gmra.mrb[50].mxu0 %vm907_vm3, %v2935_v14 }
0x1062   : > { %v3962_v13 = vpop.f32.mrb[44].mxu0 }
0x1063   : > { %v3047_v46 = vadd.f32 %v3962_v13, %v3433_v40  ;;  %v3041_v5 = vpop.f32.mrb[45].mxu0 }
0x1064   : > { %v3042_v52 = vadd.f32 %v3433_v40, %v3041_v5 }
0x1065   : > { %v3081_v16 = vadd.f32 %v3047_v46, %v5419_v38 }
0x1066   : > { %v3080_v0 = vadd.f32 %v3042_v52, %v5416_v53 }
0x1067   : > { %v3093_v15 = vsel %vm456_vm0, %v3081_v16, 0.0 }
0x1068   : > { %3094 = vadd.xlane.f32.xlu0 %v3093_v15  ;;  %v3090_v24 = vsel %vm456_vm0, %v3080_v0, 0.0 }
0x1069   : > { %3091 = vadd.xlane.f32.xlu1 %v3090_v24 }
0x106a   : > { %v3965_v36 = vpop.f32.mrb[46].mxu0 }
0x106b   : > { %v3057_v4 = vadd.f32 %v3965_v36, %v3433_v40  ;;  %v3051_v28 = vpop.f32.mrb[47].mxu0 }
0x106c   : > { %v3052_v3 = vadd.f32 %v3433_v40, %v3051_v28 }
0x106d   : > { %v3083_v47 = vadd.f32 %v3057_v4, %v5434_v12 }
0x106e   : > { %v3082_v43 = vadd.f32 %v3052_v3, %v5425_v32  ;;  %v3968_v30 = vpop.f32.mrb[48].mxu0 }
0x106f   : > { %v3067_v1 = vadd.f32 %v3968_v30, %v3433_v40  ;;  %v3061_v61 = vpop.f32.mrb[49].mxu0  ;;  %v3099_v38 = vsel %vm456_vm0, %v3083_v47, 0.0 }
0x1070   : > { %v3062_v53 = vadd.f32 %v3433_v40, %v3061_v61  ;;  %3100 = vadd.xlane.f32.xlu0 %v3099_v38  ;;  %v3096_v58 = vsel %vm456_vm0, %v3082_v43, 0.0 }
0x1071   : > { %v3085_v63 = vadd.f32 %v3067_v1, %v5444_v50  ;;  %3097 = vadd.xlane.f32.xlu1 %v3096_v58 }
0x1072   : > { %v3084_v17 = vadd.f32 %v3062_v53, %v5431_v19  ;;  %v3971_v39 = vpop.f32.mrb[50].mxu0 }
0x1073   : > { %v3077_v44 = vadd.f32 %v3971_v39, %v3433_v40  ;;  %v3071_v54 = vpop.f32.mrb[51].mxu0  ;;  %v3105_v12 = vsel %vm456_vm0, %v3085_v63, 0.0 }
0x1074   : > { %v3072_v32 = vadd.f32 %v3433_v40, %v3071_v54  ;;  %3106 = vadd.xlane.f32.xlu0 %v3105_v12  ;;  %v3102_v62 = vsel %vm456_vm0, %v3084_v17, 0.0  ;;  %v3442_v12 = vld [vmem:[%s5577_s7 + $0x2] ss:$0 sm:$0xff] }
0x1075   : > { %v3087_v11 = vadd.f32 %v3077_v44, %v5450_v25  ;;  %3103 = vadd.xlane.f32.xlu1 %v3102_v62 }
0x1076   : > { %v3086_v55 = vadd.f32 %v3072_v32, %v5441_v41 }
0x1077   : > { %v3111_v6 = vsel %vm456_vm0, %v3087_v11, 0.0 }
0x1078   : > { %3112 = vadd.xlane.f32.xlu0 %v3111_v6  ;;  %v3108_v50 = vsel %vm456_vm0, %v3086_v55, 0.0 }
0x1079   : > { %3109 = vadd.xlane.f32.xlu1 %v3108_v50  ;;  %v3443_v50 = vld [vmem:[%s5577_s7 + $0x3] ss:$0 sm:$0xff] }
0x10f5   : > { %v3095_v19 = vpop.xlane.xlu0 %3094 }
0x10f6   : > { %v3115_v31 = vmul.f32 0.03125, %v3095_v19  ;;  %v3092_v27 = vpop.xlane.xlu1 %3091 }
0x10f7   : > { %v3114_v56 = vmul.f32 0.03125, %v3092_v27 }
0x10f8   : > { %v5490_v57 = vsub.f32 %v3081_v16, %v3115_v31 }
0x10f9   : > { %v5492_v59 = vsub.f32 %v3080_v0, %v3114_v56 }
0x10fa   : > { %v3131_v25 = vmul.f32 %v5490_v57, %v5490_v57 }
0x10fb   : > { %v3130_v41 = vmul.f32 %v5492_v59, %v5492_v59 }
0x10fc   : > { %v3141_v29 = vsel %vm456_vm0, %v3131_v25, 0.0 }
0x10fd   : > { %v3101_v35 = vpop.xlane.xlu0 %3100  ;;  %3142 = vadd.xlane.f32.xlu0 %v3141_v29  ;;  %v3138_v37 = vsel %vm456_vm0, %v3130_v41, 0.0 }
0x10fe   : > { %v3117_v26 = vmul.f32 0.03125, %v3101_v35  ;;  %v3098_v2 = vpop.xlane.xlu1 %3097  ;;  %3139 = vadd.xlane.f32.xlu1 %v3138_v37 }
0x10ff   : > { %v3116_v48 = vmul.f32 0.03125, %v3098_v2 }
0x1100   : > { %v5500_v34 = vsub.f32 %v3083_v47, %v3117_v26 }
0x1101   : > { %v5502_v18 = vsub.f32 %v3082_v43, %v3116_v48  ;;  %v3107_v20 = vpop.xlane.xlu0 %3106 }
0x1102   : > { %v3119_v22 = vmul.f32 0.03125, %v3107_v20  ;;  %v3104_v8 = vpop.xlane.xlu1 %3103  ;;  %v3133_v7 = vmul.f32 %v5500_v34, %v5500_v34 }
0x1103   : > { %v3118_v21 = vmul.f32 0.03125, %v3104_v8  ;;  %v3132_v23 = vmul.f32 %v5502_v18, %v5502_v18 }
0x1104   : > { %v5508_v42 = vsub.f32 %v3085_v63, %v3119_v22  ;;  %v3147_v10 = vsel %vm456_vm0, %v3133_v7, 0.0 }
0x1105   : > { %v5511_v45 = vsub.f32 %v3084_v17, %v3118_v21  ;;  %3148 = vadd.xlane.f32.xlu0 %v3147_v10  ;;  %v3113_v9 = vpop.xlane.xlu0 %3112  ;;  %v3144_v51 = vsel %vm456_vm0, %v3132_v23, 0.0 }
0x1106   : > { %v3121_v60 = vmul.f32 0.03125, %v3113_v9  ;;  %3145 = vadd.xlane.f32.xlu1 %v3144_v51  ;;  %v3110_v33 = vpop.xlane.xlu1 %3109  ;;  %v3135_v49 = vmul.f32 %v5508_v42, %v5508_v42 }
0x1107   : > { %v3120_v14 = vmul.f32 0.03125, %v3110_v33  ;;  %v3134_v40 = vmul.f32 %v5511_v45, %v5511_v45 }
0x1108   : > { %v5518_v13 = vsub.f32 %v3087_v11, %v3121_v60  ;;  %v3153_v46 = vsel %vm456_vm0, %v3135_v49, 0.0 }
0x1109   : > { %v5521_v5 = vsub.f32 %v3086_v55, %v3120_v14  ;;  %3154 = vadd.xlane.f32.xlu0 %v3153_v46  ;;  %v3150_v52 = vsel %vm456_vm0, %v3134_v40, 0.0 }
0x110a   : > { %3151 = vadd.xlane.f32.xlu1 %v3150_v52  ;;  %v3137_v16 = vmul.f32 %v5518_v13, %v5518_v13 }
0x110b   : > { %v3136_v0 = vmul.f32 %v5521_v5, %v5521_v5 }
0x110c   : > { %v3159_v15 = vsel %vm456_vm0, %v3137_v16, 0.0 }
0x110d   : > { %3160 = vadd.xlane.f32.xlu0 %v3159_v15  ;;  %v3156_v24 = vsel %vm456_vm0, %v3136_v0, 0.0 }
0x110e   : > { %3157 = vadd.xlane.f32.xlu1 %v3156_v24 }
0x118a   : > { %v3143_v36 = vpop.xlane.xlu0 %3142 }
0x118b   : > { %v3163_v4 = vmul.f32 0.03125, %v3143_v36  ;;  %v3140_v28 = vpop.xlane.xlu1 %3139 }
0x118c   : > { %v3162_v3 = vmul.f32 0.03125, %v3140_v28 }
0x118d   : > { %v3171_v47 = vadd.f32 1e-05, %v3163_v4 }
0x118e   : > { %v3170_v43 = vadd.f32 1e-05, %v3162_v3 }
0x118f   : > { %4514 = vrsqrt.f32 %v3171_v47 }
0x1190   : > { %4516 = vrsqrt.f32 %v3170_v43 }
0x1192   : > { %v3149_v30 = vpop.xlane.xlu0 %3148 }
0x1193   : > { %v3165_v1 = vmul.f32 0.03125, %v3149_v30  ;;  %v3146_v61 = vpop.xlane.xlu1 %3145 }
0x1194   : > { %v3164_v38 = vmul.f32 0.03125, %v3146_v61 }
0x1195   : > { %v3173_v53 = vadd.f32 1e-05, %v3165_v1 }
0x1196   : > { %v3172_v58 = vadd.f32 1e-05, %v3164_v38  ;;  %v3155_v63 = vpop.xlane.xlu0 %3154 }
0x1197   : > { %4518 = vrsqrt.f32 %v3173_v53  ;;  %v3167_v17 = vmul.f32 0.03125, %v3155_v63  ;;  %v3152_v39 = vpop.xlane.xlu1 %3151 }
0x1198   : > { %4520 = vrsqrt.f32 %v3172_v58  ;;  %v3166_v44 = vmul.f32 0.03125, %v3152_v39 }
0x1199   : > { %v4515_v54 = vpop.eup %4514  ;;  %v3175_v32 = vadd.f32 1e-05, %v3167_v17 }
0x119a   : > { %v4517_v62 = vpop.eup %4516  ;;  %v3187_v11 = vmul.f32 %v4515_v54, %v5490_v57  ;;  %v3174_v55 = vadd.f32 1e-05, %v3166_v44  ;;  %v3161_v6 = vpop.xlane.xlu0 %3160 }
0x119b   : > { %v3186_v19 = vmul.f32 %v4517_v62, %v5492_v59  ;;  %4522 = vrsqrt.f32 %v3175_v32  ;;  %v3169_v31 = vmul.f32 0.03125, %v3161_v6  ;;  %v3158_v27 = vpop.xlane.xlu1 %3157 }
0x119c   : > { %v3199_v56 = vmul.f32 %v3442_v12, %v3187_v11  ;;  %4524 = vrsqrt.f32 %v3174_v55  ;;  %v3168_v25 = vmul.f32 0.03125, %v3158_v27 }
0x119d   : > { %v3198_v57 = vmul.f32 %v3442_v12, %v3186_v19  ;;  %v3177_v41 = vadd.f32 1e-05, %v3169_v31 }
0x119e   : > { %v3211_v29 = vadd.f32 %v3443_v50, %v3199_v56  ;;  %v3176_v35 = vadd.f32 1e-05, %v3168_v25 }
0x119f   : > { %v3210_v37 = vadd.f32 %v3443_v50, %v3198_v57  ;;  %4526 = vrsqrt.f32 %v3177_v41 }
0x11a0   : > { %3219 = vst.msk [vmem:[%s5543_s29 + $0x8] sm:$0xff] %vm456_vm0, %v3211_v29  ;;  %4528 = vrsqrt.f32 %v3176_v35 }
0x11a1   : > { %v4519_v59 = vpop.eup %4518  ;;  %3218 = vst.msk [vmem:[%s5543_s29] sm:$0xff] %vm456_vm0, %v3210_v37 }
0x11a2   : > { %v4521_v26 = vpop.eup %4520  ;;  %v3189_v2 = vmul.f32 %v4519_v59, %v5500_v34 }
0x11a3   : > { %v3188_v48 = vmul.f32 %v4521_v26, %v5502_v18 }
0x11a4   : > { %v3201_v20 = vmul.f32 %v3442_v12, %v3189_v2 }
0x11a5   : > { %v4523_v22 = vpop.eup %4522  ;;  %v3200_v8 = vmul.f32 %v3442_v12, %v3188_v48 }
0x11a6   : > { %v4525_v7 = vpop.eup %4524  ;;  %v3213_v21 = vadd.f32 %v3443_v50, %v3201_v20  ;;  %v3191_v23 = vmul.f32 %v4523_v22, %v5508_v42 }
0x11a7   : > { %v3212_v10 = vadd.f32 %v3443_v50, %v3200_v8  ;;  %v3190_v9 = vmul.f32 %v4525_v7, %v5511_v45 }
0x11a8   : > { %3221 = vst.msk [vmem:[%s5543_s29 + $0x18] sm:$0xff] %vm456_vm0, %v3213_v21  ;;  %v3203_v51 = vmul.f32 %v3442_v12, %v3191_v23 }
0x11a9   : > { %v4527_v34 = vpop.eup %4526  ;;  %3220 = vst.msk [vmem:[%s5543_s29 + $0x10] sm:$0xff] %vm456_vm0, %v3212_v10  ;;  %v3202_v18 = vmul.f32 %v3442_v12, %v3190_v9 }
0x11aa   : > { %v4529_v60 = vpop.eup %4528  ;;  %v3215_v33 = vadd.f32 %v3443_v50, %v3203_v51  ;;  %v3193_v49 = vmul.f32 %v4527_v34, %v5518_v13 }
0x11ab   : > { %v3214_v14 = vadd.f32 %v3443_v50, %v3202_v18  ;;  %v3192_v40 = vmul.f32 %v4529_v60, %v5521_v5 }
0x11ac   : > { %3223 = vst.msk [vmem:[%s5543_s29 + $0x28] sm:$0xff] %vm456_vm0, %v3215_v33  ;;  %v3205_v42 = vmul.f32 %v3442_v12, %v3193_v49 }
0x11ad   : > { %3222 = vst.msk [vmem:[%s5543_s29 + $0x20] sm:$0xff] %vm456_vm0, %v3214_v14  ;;  %v3204_v45 = vmul.f32 %v3442_v12, %v3192_v40 }
0x11ae   : > { %v3217_v46 = vadd.f32 %v3443_v50, %v3205_v42 }
0x11af   : > { %v3216_v52 = vadd.f32 %v3443_v50, %v3204_v45 }
0x11b0   : > { %3225 = vst.msk [vmem:[%s5543_s29 + $0x38] sm:$0xff] %vm456_vm0, %v3217_v46 }
0x11b1   : > { %3224 = vst.msk [vmem:[%s5543_s29 + $0x30] sm:$0xff] %vm456_vm0, %v3216_v52 }
0x11b2 PF: > { %s22_s21 = sadd.s32 1, %s4545_s21  }
0x11b3   : > { %p19_p4 = scmp.ge.s32.totalorder %s22_s21, 4  }
0x11b5   :  { %21 = sbr.rel (!%p19_p4) target bundleno = 1 (0x1), region = 101 }

</bundles_post_ra>
